<compile_context>
chip_gen: v7x
topology: tpu7x:2x2x1
jax: 0.10.0
libtpu: 0.0.40
codegen_flags: <defaults>
</compile_context>

<pallas_src>
import functools

import jax
import jax.numpy as jnp
from jax.experimental import pallas as pl
from jax.experimental.pallas import tpu as pltpu

_MIB = 1024 * 1024


# ---------------------------------------------------------------------------
# Kernels
# ---------------------------------------------------------------------------

def _ffn_resident_kernel(x_ref, w1_ref, b1_ref, w2_ref, b2_ref, o_ref):
    # MXU operands in the weight dtype; f32 accumulation.
    x = x_ref[...].astype(w1_ref.dtype)
    h = jnp.dot(x, w1_ref[...], preferred_element_type=jnp.float32)
    h = jnp.maximum(h + b1_ref[...], 0.0)            # bias + ReLU in f32 (VPU)
    y = jnp.dot(h.astype(w2_ref.dtype), w2_ref[...],
                preferred_element_type=jnp.float32)
    # Dropout in eval mode == identity.
    o_ref[...] = (y + b2_ref[...]).astype(o_ref.dtype)


def _ffn_htiled_kernel(x_ref, w1_ref, b1_ref, w2_ref, b2_ref, o_ref, acc_ref):
    # Grid = (row tiles, hidden tiles); hidden axis is the reduction (last,
    # "arbitrary").  acc_ref is a persistent f32 VMEM accumulator per row tile.
    k = pl.program_id(1)

    @pl.when(k == 0)
    def _():
        # Initialize with b2 so it is added exactly once.
        acc_ref[...] = jnp.broadcast_to(
            b2_ref[...].astype(jnp.float32), acc_ref.shape)

    x = x_ref[...].astype(w1_ref.dtype)
    h = jnp.dot(x, w1_ref[...], preferred_element_type=jnp.float32)
    h = jnp.maximum(h + b1_ref[...], 0.0)
    acc_ref[...] += jnp.dot(h.astype(w2_ref.dtype), w2_ref[...],
                            preferred_element_type=jnp.float32)

    @pl.when(k == pl.num_programs(1) - 1)
    def _():
        o_ref[...] = acc_ref[...].astype(o_ref.dtype)


# ---------------------------------------------------------------------------
# Sizing helpers
# ---------------------------------------------------------------------------

def _round_up(x, m):
    return ((x + m - 1) // m) * m


@functools.lru_cache(maxsize=None)
def _vmem_budgets():
    """(vmem_limit_bytes, plan_budget_bytes) for this TPU generation."""
    cap = 64 * _MIB                      # conservative fallback (v7x per-TC)
    try:
        info = pltpu.get_tpu_info()
        cap_attr = getattr(info, "vmem_capacity_bytes", None)
        if cap_attr:
            cap = int(cap_attr)
    except Exception:
        pass
    # ~102 MiB limit on v5e/v6e (128 MiB phys), ~51 MiB on v7x (64 MiB phys).
    limit = max(32 * _MIB, min(cap - 12 * _MIB, int(cap * 0.80)))
    budget = max(24 * _MIB, limit - 8 * _MIB)
    return limit, budget


def _single_buffered_spec(shape, index_map):
    """Constant-index block: DMA'd once, so single-buffer it (halves VMEM)."""
    try:
        return pl.BlockSpec(shape, index_map, pipeline_mode=pl.Buffered(1))
    except (TypeError, AttributeError):   # older jax without pipeline_mode
        return pl.BlockSpec(shape, index_map)


def _row_tiling(M, block_m):
    """Row tiles of <= ~block_m rows (multiple of 8).  At least 2 tiles when
    M allows, so the 'parallel' axis can be sharded across v7x's two
    TensorCores; padding is bounded to <8 rows per tile."""
    n_tiles = pl.cdiv(M, max(8, block_m))
    if n_tiles < 2 and M >= 16:
        n_tiles = 2
    tm = _round_up(pl.cdiv(M, n_tiles), 8)
    return tm, tm * n_tiles, n_tiles


def _resident_vmem_bytes(tm, C, H, wbytes, xbytes, obytes):
    return ((C * H + H * C) * wbytes          # W1/W2 (single-buffered)
            + (H + C) * 4                     # b1/b2 f32 (single-buffered)
            + 2 * tm * C * xbytes             # x tile (double-buffered)
            + 2 * tm * C * obytes             # out tile (double-buffered)
            + tm * H * (4 + wbytes)           # f32 h + its cast for 2nd dot
            + 2 * _MIB)                       # compiler internal scratch


def _htiled_vmem_bytes(tm, th, C, wbytes, xbytes, obytes):
    return (2 * 2 * C * th * wbytes           # W1/W2 slabs (double-buffered)
            + 2 * (th + C) * 4                # b1 slab / b2 (f32)
            + 2 * tm * C * xbytes             # x tile
            + 2 * tm * C * obytes             # out tile
            + tm * C * 4                      # f32 accumulator
            + tm * th * (4 + wbytes)          # f32 h + its cast
            + 2 * _MIB)


def cast_params_for_mxu(w1, b1, w2, b2, dtype=jnp.bfloat16):
    """Cast the weight matrices ONCE, outside the per-token call path.
    Biases are kept f32 inside the kernel regardless."""
    return w1.astype(dtype), b1, w2.astype(dtype), b2


# ---------------------------------------------------------------------------
# Wrapper
# ---------------------------------------------------------------------------

@functools.partial(jax.jit, static_argnames=("block_m", "block_h", "strategy"))
def feed_forward(x, w1, b1, w2, b2, *, block_m=512, block_h=512,
                 strategy="auto"):
    """FeedForward (Linear -> ReLU -> Linear -> Dropout[eval]) on (B, T, C)."""
    B, T, C = x.shape
    H = w1.shape[1]                    # 4 * n_embd
    out_dtype = x.dtype
    M = B * T

    vmem_limit, vmem_budget = _vmem_budgets()

    wbytes = jnp.dtype(w1.dtype).itemsize
    xbytes = jnp.dtype(x.dtype).itemsize
    obytes = jnp.dtype(out_dtype).itemsize

    # Biases stay f32 for the VPU add/ReLU path (tiny, cast per call is free).
    b1_2d = b1.reshape(1, H).astype(jnp.float32)
    b2_2d = b2.reshape(1, C).astype(jnp.float32)

    tm, Mp, n_row = _row_tiling(M, block_m)

    # ---- strategy selection -------------------------------------------------
    resident_fits = (_resident_vmem_bytes(tm, C, H, wbytes, xbytes, obytes)
                     <= vmem_budget)
    # With <2 natural row tiles there is no pipelining to hide the one-shot
    # W1/W2 DMA -> prefer streaming the weights in hidden slabs.
    enough_rows = pl.cdiv(M, block_m) >= 2
    if strategy == "resident":
        use_resident = True
    elif strategy == "htiled":
        use_resident = False
    else:
        use_resident = resident_fits and enough_rows

    th = H
    if not use_resident:
        # Hidden-slab size: largest multiple of 128 that divides H and whose
        # streamed plan fits the per-generation VMEM budget.
        start = max(128, (min(block_h, H) // 128) * 128)
        cands = [t for t in range(start, 0, -128) if H % t == 0] or [H]
        th = cands[-1]
        for cand in cands:
            if _htiled_vmem_bytes(tm, cand, C, wbytes, xbytes, obytes) <= vmem_budget:
                th = cand
                break
        # Still over budget -> shrink the row tile.
        target_tm = tm
        while (_htiled_vmem_bytes(target_tm, th, C, wbytes, xbytes, obytes)
               > vmem_budget and target_tm > 8):
            target_tm = max(8, target_tm // 2)
        if target_tm != tm:
            tm, Mp, n_row = _row_tiling(M, target_tm)

    # ---- pad rows (bounded to <8 rows per tile by _row_tiling) --------------
    x2 = x.reshape(M, C)
    if Mp != M:
        x2 = jnp.pad(x2, ((0, Mp - M), (0, 0)))

    # ---- advisory cost estimate ---------------------------------------------
    flops = 4 * Mp * C * H                                    # two matmuls
    weight_bytes = (C * H + H * C) * wbytes
    weight_passes = 1 if use_resident else n_row              # htiled re-streams
    bytes_accessed = (Mp * C * (xbytes + obytes)
                      + weight_passes * weight_bytes
                      + (H + C) * 4)
    cost = pl.CostEstimate(flops=flops, transcendentals=0,
                           bytes_accessed=bytes_accessed)

    if use_resident:
        grid_spec = pltpu.PrefetchScalarGridSpec(
            num_scalar_prefetch=0,
            grid=(Mp // tm,),
            in_specs=[
                pl.BlockSpec((tm, C), lambda i: (i, 0)),           # x rows
                _single_buffered_spec((C, H), lambda i: (0, 0)),   # W1 resident
                _single_buffered_spec((1, H), lambda i: (0, 0)),   # b1
                _single_buffered_spec((H, C), lambda i: (0, 0)),   # W2 resident
                _single_buffered_spec((1, C), lambda i: (0, 0)),   # b2
            ],
            out_specs=pl.BlockSpec((tm, C), lambda i: (i, 0)),
        )
        out = pl.pallas_call(
            _ffn_resident_kernel,
            out_shape=jax.ShapeDtypeStruct((Mp, C), out_dtype),
            grid_spec=grid_spec,
            compiler_params=pltpu.CompilerParams(
                dimension_semantics=("parallel",),
                vmem_limit_bytes=vmem_limit),
            cost_estimate=cost,
        )(x2, w1, b1_2d, w2, b2_2d)
    else:
        grid_spec = pltpu.PrefetchScalarGridSpec(
            num_scalar_prefetch=0,
            grid=(Mp // tm, H // th),                      # reduction axis last
            in_specs=[
                pl.BlockSpec((tm, C), lambda i, k: (i, 0)),   # x rows
                pl.BlockSpec((C, th), lambda i, k: (0, k)),   # W1 hidden slab
                pl.BlockSpec((1, th), lambda i, k: (0, k)),   # b1 slab
                pl.BlockSpec((th, C), lambda i, k: (k, 0)),   # W2 hidden slab
                _single_buffered_spec((1, C), lambda i, k: (0, 0)),  # b2
            ],
            out_specs=pl.BlockSpec((tm, C), lambda i, k: (i, 0)),
            scratch_shapes=[pltpu.VMEM((tm, C), jnp.float32)],
        )
        out = pl.pallas_call(
            _ffn_htiled_kernel,
            out_shape=jax.ShapeDtypeStruct((Mp, C), out_dtype),
            grid_spec=grid_spec,
            compiler_params=pltpu.CompilerParams(
                dimension_semantics=("parallel", "arbitrary"),
                vmem_limit_bytes=vmem_limit),
            cost_estimate=cost,
        )(x2, w1, b1_2d, w2, b2_2d)

    if Mp != M:
        out = out[:M]
    return out.reshape(B, T, C)


# ---------------------------------------------------------------------------
# Params + self-test
# ---------------------------------------------------------------------------

def _init_params(key, n_embd, dtype=jnp.float32):
    """PyTorch-style uniform(-1/sqrt(fan_in), 1/sqrt(fan_in)) init."""
    hidden = 4 * n_embd
    k1, k2, k3, k4 = jax.random.split(key, 4)
    bound1 = 1.0 / jnp.sqrt(jnp.float32(n_embd))
    bound2 = 1.0 / jnp.sqrt(jnp.float32(hidden))
    w1 = jax.random.uniform(k1, (n_embd, hidden), dtype, -bound1, bound1)
    b1 = jax.random.uniform(k2, (hidden,), dtype, -bound1, bound1)
    w2 = jax.random.uniform(k3, (hidden, n_embd), dtype, -bound2, bound2)
    b2 = jax.random.uniform(k4, (n_embd,), dtype, -bound2, bound2)
    return w1, b1, w2, b2


if __name__ == "__main__":
    # Module-consistent shapes: batch=2, seq=8, n_embd=384 (hidden=1536).
    B, T, n_embd = 2, 8, 384
    key = jax.random.PRNGKey(0)
    kx, kp = jax.random.split(key)

    x = jax.random.normal(kx, (B, T, n_embd), dtype=jnp.float32)
    w1, b1, w2, b2 = _init_params(kp, n_embd)

    # Pure-JAX reference (eval-mode dropout == identity), full-precision dots.
    def _dot_hp(a, b):
        return jnp.dot(a, b, precision=jax.lax.Precision.HIGHEST)
    ref = (_dot_hp(jnp.maximum(_dot_hp(x.reshape(-1, n_embd), w1) + b1, 0.0),
                   w2) + b2).reshape(B, T, n_embd)

    # 1) auto: small M -> hidden-slab streamed path (weight DMA overlapped).
    y = jax.block_until_ready(feed_forward(x, w1, b1, w2, b2))
    assert y.shape == (B, T, n_embd)
    assert jnp.allclose(y, ref, atol=2e-4, rtol=2e-4)

    # 2) forced weights-resident path (single-buffered W1/W2 via pl.Buffered(1)).
    y_r = jax.block_until_ready(
        feed_forward(x, w1, b1, w2, b2, strategy="resident"))
    assert jnp.allclose(y_r, ref, atol=2e-4, rtol=2e-4)

    # 3) bf16 weights, cast ONCE outside the jitted call path (fast MXU path).
    w1b, b1b, w2b, b2b = cast_params_for_mxu(w1, b1, w2, b2, jnp.bfloat16)
    y_bf = jax.block_until_ready(feed_forward(x, w1b, b1b, w2b, b2b))
    assert jnp.allclose(y_bf, ref, atol=1e-1, rtol=1e-1)

    print("KERNEL_OK")
</pallas_src>

<mosaic_0001>
module attributes {stable_mosaic.version = 11 : i64} {
  func.func @_ffn_htiled_kernel(%arg0: i32, %arg1: i32, %arg2: memref<8x384xf32, #tpu.memory_space<vmem>>, %arg3: memref<384x512xf32, #tpu.memory_space<vmem>>, %arg4: memref<1x512xf32, #tpu.memory_space<vmem>>, %arg5: memref<512x384xf32, #tpu.memory_space<vmem>>, %arg6: memref<1x384xf32, #tpu.memory_space<vmem>>, %arg7: memref<8x384xf32, #tpu.memory_space<vmem>>, %arg8: memref<8x384xf32, #tpu.memory_space<vmem>>) attributes {dimension_semantics = [#tpu.dimension_semantics<parallel>, #tpu.dimension_semantics<arbitrary>], iteration_bounds = array<i64: 2, 3>, scalar_prefetch = 0 : i64, scratch_operands = 1 : i64, tpu.core_type = #tpu.core_type<tc>, window_params = [{transform_indices = @transform_0, window_bounds = array<i64: 8, 384>}, {transform_indices = @transform_1, window_bounds = array<i64: 384, 512>}, {transform_indices = @transform_2, window_bounds = array<i64: 1, 512>}, {transform_indices = @transform_3, window_bounds = array<i64: 512, 384>}, {pipeline_mode = #tpu.pipeline_mode<synchronous>, transform_indices = @transform_4, window_bounds = array<i64: 1, 384>}, {transform_indices = @transform_5, window_bounds = array<i64: 8, 384>}]} {
    %c0_i32 = arith.constant 0 : i32
    %0 = arith.cmpi eq, %arg1, %c0_i32 : i32
    %1 = arith.extui %0 : i1 to i32
    %c0_i32_0 = arith.constant 0 : i32
    %2 = arith.cmpi ne, %1, %c0_i32_0 : i32
    scf.if %2 {
      %c0_15 = arith.constant 0 : index
      %c0_16 = arith.constant 0 : index
      %19 = vector.load %arg6[%c0_15, %c0_16] : memref<1x384xf32, #tpu.memory_space<vmem>>, vector<1x384xf32>
      %20 = vector.shape_cast %19 : vector<1x384xf32> to vector<1x384xf32>
      %21 = vector.broadcast %20 : vector<1x384xf32> to vector<8x384xf32>
      %c0_17 = arith.constant 0 : index
      %c0_18 = arith.constant 0 : index
      %22 = vector.load %arg8[%c0_17, %c0_18] : memref<8x384xf32, #tpu.memory_space<vmem>>, vector<8x384xf32>
      tpu.vector_store %arg8[%c0_17, %c0_18], %21 {strides = array<i32>} : memref<8x384xf32, #tpu.memory_space<vmem>>, vector<8x384xf32>,
    } else {
    }
    %c0 = arith.constant 0 : index
    %c0_1 = arith.constant 0 : index
    %3 = vector.load %arg2[%c0, %c0_1] : memref<8x384xf32, #tpu.memory_space<vmem>>, vector<8x384xf32>
    %c0_2 = arith.constant 0 : index
    %c0_3 = arith.constant 0 : index
    %4 = vector.load %arg3[%c0_2, %c0_3] : memref<384x512xf32, #tpu.memory_space<vmem>>, vector<384x512xf32>
    %cst = arith.constant dense<0.000000e+00> : vector<8x512xf32>
    %5 = tpu.matmul %3, %4, %cst {dimension_numbers = #tpu.dot_dimension_numbers<[1], [0], [0], [1], [0, 0, 1, 1], [], []>} : vector<8x384xf32>, vector<384x512xf32>, vector<8x512xf32> -> vector<8x512xf32>
    %c0_4 = arith.constant 0 : index
    %c0_5 = arith.constant 0 : index
    %6 = vector.load %arg4[%c0_4, %c0_5] : memref<1x512xf32, #tpu.memory_space<vmem>>, vector<1x512xf32>
    %7 = vector.broadcast %6 : vector<1x512xf32> to vector<8x512xf32>
    %8 = arith.addf %5, %7 : vector<8x512xf32>
    %cst_6 = arith.constant 0.000000e+00 : f32
    %9 = vector.broadcast %cst_6 : f32 to vector<8x512xf32>
    %10 = arith.maximumf %8, %9 : vector<8x512xf32>
    %c0_7 = arith.constant 0 : index
    %c0_8 = arith.constant 0 : index
    %11 = vector.load %arg8[%c0_7, %c0_8] : memref<8x384xf32, #tpu.memory_space<vmem>>, vector<8x384xf32>
    %c0_9 = arith.constant 0 : index
    %c0_10 = arith.constant 0 : index
    %12 = vector.load %arg5[%c0_9, %c0_10] : memref<512x384xf32, #tpu.memory_space<vmem>>, vector<512x384xf32>
    %cst_11 = arith.constant dense<0.000000e+00> : vector<8x384xf32>
    %13 = tpu.matmul %10, %12, %cst_11 {dimension_numbers = #tpu.dot_dimension_numbers<[1], [0], [0], [1], [0, 0, 1, 1], [], []>} : vector<8x512xf32>, vector<512x384xf32>, vector<8x384xf32> -> vector<8x384xf32>
    %14 = arith.addf %11, %13 : vector<8x384xf32>
    %c0_12 = arith.constant 0 : index
    %c0_13 = arith.constant 0 : index
    %15 = vector.load %arg8[%c0_12, %c0_13] : memref<8x384xf32, #tpu.memory_space<vmem>>, vector<8x384xf32>
    tpu.vector_store %arg8[%c0_12, %c0_13], %14 {strides = array<i32>} : memref<8x384xf32, #tpu.memory_space<vmem>>, vector<8x384xf32>,
    %c2_i32 = arith.constant 2 : i32
    %16 = arith.cmpi eq, %arg1, %c2_i32 : i32
    %17 = arith.extui %16 : i1 to i32
    %c0_i32_14 = arith.constant 0 : i32
    %18 = arith.cmpi ne, %17, %c0_i32_14 : i32
    scf.if %18 {
      %c0_15 = arith.constant 0 : index
      %c0_16 = arith.constant 0 : index
      %19 = vector.load %arg8[%c0_15, %c0_16] : memref<8x384xf32, #tpu.memory_space<vmem>>, vector<8x384xf32>
      %c0_17 = arith.constant 0 : index
      %c0_18 = arith.constant 0 : index
      %20 = vector.load %arg7[%c0_17, %c0_18] : memref<8x384xf32, #tpu.memory_space<vmem>>, vector<8x384xf32>
      tpu.vector_store %arg7[%c0_17, %c0_18], %19 {strides = array<i32>} : memref<8x384xf32, #tpu.memory_space<vmem>>, vector<8x384xf32>,
    } else {
    }
    return
  }
  func.func @transform_0(%arg0: i32, %arg1: i32) -> (i32, i32) {
    %c0_i32 = arith.constant 0 : i32
    %c0_i32_0 = arith.constant 0 : i32
    return %arg0, %c0_i32 : i32, i32
  }
  func.func @transform_1(%arg0: i32, %arg1: i32) -> (i32, i32) {
    %c0_i32 = arith.constant 0 : i32
    %c0_i32_0 = arith.constant 0 : i32
    return %c0_i32, %arg1 : i32, i32
  }
  func.func @transform_2(%arg0: i32, %arg1: i32) -> (i32, i32) {
    %c0_i32 = arith.constant 0 : i32
    %c0_i32_0 = arith.constant 0 : i32
    return %c0_i32, %arg1 : i32, i32
  }
  func.func @transform_3(%arg0: i32, %arg1: i32) -> (i32, i32) {
    %c0_i32 = arith.constant 0 : i32
    %c0_i32_0 = arith.constant 0 : i32
    return %arg1, %c0_i32 : i32, i32
  }
  func.func @transform_4(%arg0: i32, %arg1: i32) -> (i32, i32) {
    %c0_i32 = arith.constant 0 : i32
    %c0_i32_0 = arith.constant 0 : i32
    %c0_i32_1 = arith.constant 0 : i32
    return %c0_i32, %c0_i32_0 : i32, i32
  }
  func.func @transform_5(%arg0: i32, %arg1: i32) -> (i32, i32) {
    %c0_i32 = arith.constant 0 : i32
    %c0_i32_0 = arith.constant 0 : i32
    return %arg0, %c0_i32 : i32, i32
  }
}

</mosaic_0001>

<bundles_post_ra>
// kernel: feed_forward.1
= control target key start
LH: loop header
LB: loop body
LE: loop exit
PB: predicated region body
PF: predicated region fallthrough
CT: control target
= control target key end

     0   :  { %s3160_s0 = inlined_call_operand.hbm [shape: f32[16,384], index: 0, kind: input, shape index: {}]   ;;  %s3161_s1 = inlined_call_operand.hbm [shape: f32[384,1536], index: 1, kind: input, shape index: {}]   ;;  %s3162_s2 = inlined_call_operand.vmem [shape: f32[1,1536], index: 2, kind: input, shape index: {}]   ;;  %s3163_s3 = inlined_call_operand.hbm [shape: f32[1536,384], index: 3, kind: input, shape index: {}]   ;;  %s3164_s4 = inlined_call_operand.vmem [shape: f32[1,384], index: 4, kind: input, shape index: {}]   ;;  %s3165_s5 = inlined_call_operand.hbm [shape: f32[16,384], index: 5, kind: output, shape index: {}]  }
   0x1   :  { %3178 = sst [smem:[#allocation22_spill]] %s3161_s1 }
   0x2   :  { %3179 = sst [smem:[#allocation23_spill]] %s3162_s2 }
   0x3   :  { %3180 = sst [smem:[#allocation24_spill]] %s3164_s4 }
   0x4   :  { %3181 = sst [smem:[#allocation25_spill]] %s3165_s5 }
   0x5   :  { %10 = vsyncpa [#allocation4], 0 }
   0x6   :  { %12 = vsyncpa [#allocation4 + $0x1], 0 }
   0x7   :  { %13 = vsyncpa [#allocation7], 0 }
   0x8   :  { %15 = vsyncpa [#allocation7 + $0x1], 0 }
   0x9   :  { %16 = vsyncpa [#allocation5], 0 }
   0xa   :  { %18 = vsyncpa [#allocation5 + $0x1], 0  ;;  %s2388_s18 = smov 0   ;;  %s2390_s19 = smov 0  }
   0xb   :  { %s2392_s20 = smov 0   ;;  %s2394_s21 = smov 0  }
   0xc   :  { %s2396_s22 = smov 0   ;;  %s2398_s23 = smov 0  }
   0xd   :  { %s2400_s24 = smov 0   ;;  %s2402_s25 = smov 0  }
   0xe   :  { %s2404_s26 = smov 0   ;;  %s2406_s27 = smov 0  }
   0xf   :  { %s2408_s28 = smov 0  }
  0x10 LB: > { %3182 = sst [smem:[#allocation13_spill]] %s2314_s20  ;;  %p51_p0 = scmp.eq.s32.totalorder %s2346_s28, 0  ;;  %s2346_s28 = sphi %s2408_s28, %s24_s28   ;;  %s2342_s27 = sphi %s2406_s27, %s3222_s27   ;;  %s2338_s26 = sphi %s2404_s26, %s3221_s26   ;;  %s2334_s25 = sphi %s2402_s25, %s3220_s25   ;;  %s2330_s24 = sphi %s2400_s24, %s3219_s24   ;;  %s2326_s23 = sphi %s2398_s23, %s3218_s23   ;;  %s2322_s22 = sphi %s2396_s22, %s3226_s22   ;;  %s2318_s21 = sphi %s2394_s21, %s3225_s21   ;;  %s2314_s20 = sphi %s2392_s20, %s3216_s20   ;;  %s2310_s19 = sphi %s2390_s19, %s3224_s19   ;;  %s2306_s18 = sphi %s2388_s18, %s3223_s18  }
  0x11   : > { %3183 = sst [smem:[#allocation14_spill]] %s2326_s23  ;;  %p76_p1 = scmp.ne.s32.totalorder %s2314_s20, %s2310_s19 }
  0x12   : > { %3184 = sst [smem:[#allocation15_spill]] %s2334_s25  ;;  %p3166_p2 = scmp.lt.s32.totalorder %s2346_s28, 6 }
  0x13   : > { %3185 = sst [smem:[#allocation16_spill]] %s2338_s26  ;;  %s227_s30 = sand.u32 1, %s2346_s28  }
  0x14   : > { %3186 = sst [smem:[#allocation17_spill]] %s2342_s27  ;;  %p78_p3 = por %p76_p1, %p51_p0 }
  0x15   : > { %s229_s6 = sand.u32 1, %s2314_s20   ;;  %s1539_s7 = sshll.u32 %s2338_s26, 9 }
  0x16   : > { %s2453_s8 = smul.u32 1536, %s229_s6  ;;  %s3187_s1 = sld [smem:[#allocation22_spill]] }
  0x17   : > { %p2462_p4 = pnand %p3166_p2, %p78_p3  ;;  %s2469_s15 = scalar_lea.sflag [#allocation7], %s227_s30 }
  0x18   : > { %s231_s13 = scalar_lea.vmem [#allocation6], %s2453_s8 }
  0x19   : > { %s238_s14 = sshll.u32 %s231_s13, 4  ;;  %p3169_p6 = pneg %p2462_p4  ;;  %s2467_s14 = int_to_ptr.vmem [resolvable:$true] %s238_s14 }
  0x1c   : > { %s2458_s11 = scalar_lea.hbm %s3187_s1, %s1539_s7  ;;  %s2135_s7 = scalar_lea.hbm %s3187_s1, 73728 }
  0x1d   : > { %s2130_s16 = scalar_lea.hbm %s2458_s11, 24576  ;;  %p2136_p9 = scmp.lt.u32.totalorder %s2458_s11, %s3187_s1 }
  0x1e   : > { %p2131_p5 = scmp.ne.s32.totalorder %s2458_s11, %s2130_s16  ;;  %p2137_p10 = scmp.lt.u32.totalorder %s2135_s7, %s2130_s16 }
  0x1f   : > { %p2139_p12 = scmp.lt.u32.totalorder %s2130_s16, %s2458_s11 }
  0x20   : > { %p2133_p7 = pnand %p3169_p6, %p2131_p5  ;;  %p2138_p11 = por %p2137_p10, %p2136_p9 }
  0x22   : > { %p2134_p8 = pneg %p2133_p7  ;;  %p2140_p13 = por %p2139_p12, %p2138_p11 }
  0x24   : > { %p2141_p1 = pnand %p2140_p13, %p2134_p8 }
  0x26   : > { %2144 = shalt.err (!%p2141_p1)
}
  0x27   : > { %s2145_s30 = scalar_lea.vmem %s2467_s14, 24576  ;;  %s2348_s13 = smov [#allocation6]  }
  0x28   : > { %p2146_p3 = scmp.ne.s32.totalorder %s2467_s14, %s2145_s30  ;;  %s2150_s17 = sshll.u32 %s2348_s13, 4  ;;  %s2151_s17 = int_to_ptr.vmem [resolvable:$false] %s2150_s17 }
  0x29   : > { %s2152_s6 = scalar_lea.vmem %s2151_s17, 49152  ;;  %p2153_p2 = scmp.lt.s32.totalorder %s2467_s14, %s2151_s17 }
  0x2a   : > { %p2148_p5 = pnand %p2146_p3, %p3169_p6  ;;  %p2154_p9 = scmp.lt.s32.totalorder %s2152_s6, %s2145_s30 }
  0x2c   : > { %p2149_p7 = pneg %p2148_p5  ;;  %p2155_p10 = por %p2154_p9, %p2153_p2 }
  0x2e   : > { %p2156_p11 = pnand %p2155_p10, %p2149_p7 }
  0x30   : > { %2159 = shalt.err (!%p2156_p11)
}
  0x31   : > { %s2349_s16 = smov 1536   ;;  %s2350_s7 = smov 512  }
  0x32   : > { %s2351_s9 = smov 32   ;;  %p1532_p2 = scmp.ge.s32.totalorder %s2346_s28, 1 }
  0x33   : > { %2026 = dma.hbm_to_vmem [thread:$0]  (!%p2462_p4), %s2458_s11, 24576, %s2467_s14, %s2469_s15, %s2349_s16, %s2350_s7, %s2351_s9  }
  0x34   : > { %p276_p8 = scmp.lt.s32.totalorder %s2346_s28, 7  ;;  %s2504_s30 = sadd.s32 4294967295, %s2346_s28  }
  0x35   : > { %s1523_s13 = sadd.s32 4294967294, %s2346_s28   ;;  %s33_s17 = sadd.s32 1, %s2338_s26 }
  0x36   : > { %p2499_p12 = pnand %p1532_p2, %p276_p8  ;;  %p34_p13 = scmp.ge.s32.totalorder %s33_s17, 3 }
  0x37   : > { %s36_s6 = sadd.s32 1, %s2342_s27  ;;  %s43_s11 = sadd.s32 1, %s2326_s23 }
  0x38   : > { %s3189_s10 = scalar_select %p2499_p12, 1, 0 }
  0x39   : > { %p50_p1 = scmp.ne.s32.totalorder %s2326_s23, %s2322_s22  ;;  %s3228_s17 = smov (%p34_p13, %s33_s17), 0 }
  0x3a   : > { %3190 = sst [smem:[#allocation18_spill]] %s3228_s17  ;;  %s3230_s6 = smov (!%p34_p13, %s36_s6), %s2342_s27 }
  0x3b   : > { %p2520_p3 = por %p51_p0, %p50_p1  ;;  %p56_p5 = scmp.ne.s32.totalorder %s2322_s22, %s2318_s21 }
  0x3c   : > { %p38_p7 = scmp.ge.s32.totalorder %s3230_s6, 2  ;;  %p57_p9 = scmp.eq.s32.totalorder %s2504_s30, 0 }
  0x3d   : > { %s66_s16 = ssub.s32 %s2338_s26, %s3228_s17  ;;  %p82_p10 = scmp.ne.s32.totalorder %s2310_s19, %s2306_s18 }
  0x3e   : > { %s3232_s6 = smov (%p38_p7, %s3230_s6), 0  ;;  %p2536_p11 = por %p57_p9, %p56_p5 }
  0x3f   : > { %3192 = sst [smem:[#allocation19_spill]] %s3232_s6  ;;  %p67_p0 = scmp.eq.s32.totalorder %s66_s16, 0 }
  0x40   : > { %s3193_s7 = scalar_select %p2536_p11, 1, 0 }
  0x41   : > { %s40_s9 = ssub.s32 %s2342_s27, %s3232_s6  ;;  %p2542_p2 = por %p82_p10, %p57_p9 }
  0x42   : > { %p41_p8 = scmp.eq.s32.totalorder %s40_s9, 0  ;;  %p179_p13 = scmp.eq.s32.totalorder %s2504_s30, 5 }
  0x43   : > { %s3194_s29 = scalar_select %p2542_p2, 1, 0 }
  0x44   : > { %s3195_s18 = sadd.s32 1, %s2314_s20  ;;  %p2558_p7 = por %p179_p13, %p50_p1 }
  0x45   : > { %s2550_s1 = scalar_select %p67_p0, %s2314_s20, %s3195_s18  }
  0x46   : > { %s2553_s17 = scalar_select %p41_p8, %s2326_s23, %s43_s11  }
  0x47   : > { %3196 = sst [smem:[#allocation20_spill]] %s2550_s1  ;;  %p185_p6 = scmp.eq.s32.totalorder %s1523_s13, 5 }
  0x48   : > { %3197 = sst [smem:[#allocation21_spill]] %s2553_s17  ;;  %s208_s25 = sand.u32 1, %s2326_s23  }
  0x49   : > { %s3198_s5 = scalar_select %p2558_p7, 1, 0 }
  0x4a   : > { %s2005_s16 = smul.u32 384, %s2342_s27  ;;  %p2567_p9 = por %p185_p6, %p56_p5 }
  0x4b   : > { %s2004_s9 = smul.u32 24, %s208_s25  ;;  %p3200_p10 = scmp.lt.s32.totalorder %s2346_s28, 6 }
  0x4c   : > { %s3199_s6 = scalar_select %p2567_p9, 1, 0 }
  0x4d   : > { %s2574_s18 = scalar_lea.hbm %s3160_s0, %s2005_s16  ;;  %p2580_p1 = pnand %p3200_p10, %p2520_p3 }
  0x4e   : > { %s2008_s11 = smul.u32 24576, %s2338_s26  ;;  %s212_s27 = scalar_lea.vmem [#allocation3], %s2004_s9 }
  0x4f   : > { %s220_s17 = sshll.u32 %s212_s27, 4  ;;  %s209_s16 = scalar_lea.sflag [#allocation4], %s208_s25  ;;  %s2585_s17 = int_to_ptr.vmem [resolvable:$true] %s220_s17 }
  0x50   : > { %s2590_s14 = scalar_lea.hbm %s3163_s3, %s2008_s11  ;;  %s2160_s23 = scalar_lea.hbm %s2574_s18, 384 }
  0x51   : > { %p2161_p6 = scmp.ne.s32.totalorder %s2574_s18, %s2160_s23  ;;  %p2162_p3 = pneg %p2580_p1 }
  0x52   : > { %s2165_s27 = scalar_lea.hbm %s3160_s0, 768  ;;  %p2166_p8 = scmp.lt.u32.totalorder %s2574_s18, %s3160_s0 }
  0x53   : > { %p2163_p5 = pnand %p2162_p3, %p2161_p6  ;;  %p2167_p13 = scmp.lt.u32.totalorder %s2165_s27, %s2160_s23 }
  0x54   : > { %p2169_p9 = scmp.lt.u32.totalorder %s2160_s23, %s2574_s18 }
  0x55   : > { %p2164_p0 = pneg %p2163_p5  ;;  %p2168_p10 = por %p2167_p13, %p2166_p8 }
  0x57   : > { %p2170_p7 = por %p2169_p9, %p2168_p10 }
  0x59   : > { %p2171_p2 = pnand %p2170_p7, %p2164_p0 }
  0x5b   : > { %2174 = shalt.err (!%p2171_p2)
}
  0x5c   : > { %s2175_s25 = scalar_lea.vmem %s2585_s17, 384  ;;  %s2352_s1 = smov [#allocation3]  }
  0x5d   : > { %p2176_p6 = scmp.ne.s32.totalorder %s2585_s17, %s2175_s25  ;;  %s2180_s26 = sshll.u32 %s2352_s1, 4  ;;  %s2181_s26 = int_to_ptr.vmem [resolvable:$false] %s2180_s26 }
  0x5e   : > { %s2182_s20 = scalar_lea.vmem %s2181_s26, 768  ;;  %p2183_p12 = scmp.lt.s32.totalorder %s2585_s17, %s2181_s26 }
  0x5f   : > { %p2178_p5 = pnand %p2176_p6, %p2162_p3  ;;  %p2184_p8 = scmp.lt.s32.totalorder %s2182_s20, %s2175_s25 }
  0x61   : > { %p2179_p11 = pneg %p2178_p5  ;;  %p2185_p13 = por %p2184_p8, %p2183_p12 }
  0x63   : > { %p2186_p9 = pnand %p2185_p13, %p2179_p11 }
  0x65   : > { %2189 = shalt.err (!%p2186_p9)
}
  0x66   : > { %2023 = dma.hbm_to_vmem [thread:$0]  (!%p2580_p1), %s2574_s18, 384, %s2585_s17, %s209_s16  }
  0x67   : > { %s260_s23 = scalar_lea.vmem [#allocation8], %s2453_s8  ;;  %s2190_s2 = scalar_lea.hbm %s2590_s14, 24576 }
  0x68   : > { %s268_s11 = sshll.u32 %s260_s23, 4  ;;  %p2191_p2 = scmp.ne.s32.totalorder %s2590_s14, %s2190_s2  ;;  %s2618_s11 = int_to_ptr.vmem [resolvable:$true] %s268_s11 }
  0x69   : > { %p3202_p12 = pneg %p2462_p4  ;;  %s2195_s27 = scalar_lea.hbm %s3163_s3, 73728 }
  0x6a   : > { %p2196_p3 = scmp.lt.u32.totalorder %s2590_s14, %s3163_s3  ;;  %p2197_p0 = scmp.lt.u32.totalorder %s2195_s27, %s2190_s2 }
  0x6b   : > { %p2193_p11 = pnand %p2191_p2, %p3202_p12  ;;  %p2199_p10 = scmp.lt.u32.totalorder %s2190_s2, %s2590_s14 }
  0x6c   : > { %p2198_p1 = por %p2197_p0, %p2196_p3 }
  0x6d   : > { %p2194_p7 = pneg %p2193_p11 }
  0x6e   : > { %p2200_p6 = por %p2199_p10, %p2198_p1 }
  0x70   : > { %p2201_p5 = pnand %p2200_p6, %p2194_p7 }
  0x72   : > { %2204 = shalt.err (!%p2201_p5)
}
  0x73   : > { %s2205_s8 = scalar_lea.vmem %s2618_s11, 24576  ;;  %p3203_p13 = pmov %p3202_p12 }
  0x74   : > { %p2206_p8 = scmp.ne.s32.totalorder %s2618_s11, %s2205_s8  ;;  %s2353_s17 = smov [#allocation8]  }
  0x75   : > { %s2210_s18 = sshll.u32 %s2353_s17, 4  ;;  %s2211_s18 = int_to_ptr.vmem [resolvable:$false] %s2210_s18 }
  0x76   : > { %p2208_p9 = pnand %p2206_p8, %p3203_p13  ;;  %s2212_s16 = scalar_lea.vmem %s2211_s18, 49152 }
  0x77   : > { %p2213_p12 = scmp.lt.s32.totalorder %s2618_s11, %s2211_s18  ;;  %p2214_p11 = scmp.lt.s32.totalorder %s2212_s16, %s2205_s8 }
  0x78   : > { %p2209_p2 = pneg %p2208_p9 }
  0x79   : > { %p2215_p3 = por %p2214_p11, %p2213_p12 }
  0x7b   : > { %p2216_p0 = pnand %p2215_p3, %p2209_p2 }
  0x7d   : > { %2219 = shalt.err (!%p2216_p0)
}
  0x7e   : > { %s2354_s1 = smov 384   ;;  %s2355_s26 = smov 24  }
  0x7f   : > { %2029 = dma.hbm_to_vmem [thread:$0]  (!%p2462_p4), %s2590_s14, 24576, %s2618_s11, %s2469_s15, %s2354_s1, %s2354_s1, %s2355_s26  }
  0x80   : > { %p3204_p7 = scmp.ne.s32.totalorder %s3189_s10, 0 }
  0x81   : > { %s2647_s20 = sand.u32 (!%p3204_p7), 1, %s2322_s22   ;;  %p3205_p1 = scmp.ne.s32.totalorder (!%p3204_p7), %s3193_s7, 0 }
  0x82   : > { %280 = sbr.rel (%p3204_p7) target bundleno = 764 (0x2fc), region = 40  ;;  %s283_s2 = scalar_lea.sflag (!%p3204_p7), [#allocation4], %s2647_s20 }
  0x83   : > { %s2009_s23 = smul.u32 (!%p3204_p7), 24, %s2647_s20 }
  0x85   : > { %s2651_s13 = scalar_lea.vmem (!%p3204_p7), [#allocation3], %s2009_s23 }
  0x89   : > { %2293 = dma.done.wait (%p3205_p1), %s283_s2, 384  }
  0x8a   : > { %2295 = vsyncadd (%p3205_p1), %s283_s2, 4294966912  ;;  %s291_s12 = sand.u32 1, %s2504_s30   ;;  %s293_s15 = sand.u32 1, %s2310_s19  }
  0x8b   : > { %s2010_s10 = smul.u32 1536, %s293_s15  ;;  %s292_s14 = scalar_lea.sflag [#allocation7], %s291_s12 }
  0x8c   : > { %p3206_p4 = scmp.ne.s32.totalorder %s3194_s29, 0 }
  0x8d   : > { %s2659_s11 = scalar_lea.vmem [#allocation6], %s2010_s10 }
  0x8e   : > { %2297 = dma.done.wait (%p3206_p4), %s292_s14, 49152  }
  0x8f   : > { %2299 = vsyncadd (%p3206_p4), %s292_s14, 4294918144  ;;  %s1533_s4 = sshll.u32 %s2330_s24, 2  ;;  %s3207_s9 = sld [smem:[#allocation23_spill]] }
  0x90   : > { %p347_p10 = scmp.lt.s32.totalorder %s1533_s4, 11  ;;  %s2672_s25 = scalar_lea.vmem [#allocation8], %s2010_s10 }
  0x91   : > { %s2674_s8 = scalar_lea.vmem [#allocation9], %s2009_s23  ;;  %p1534_p6 = scmp.ne.s32.totalorder %s2330_s24, 0 }
  0x92   : > { %s3234_s4 = smov (!%p347_p10, %s1533_s4), 11  ;;  %v358_v0 = vlaneseq (!%p1534_p6)  ;;  %s3208_s18 = sld [smem:[#allocation24_spill]] (!%p1534_p6) }
  0x93   : > { %355 = sbr.rel (%p1534_p6) target bundleno = 157 (0x9d), region = 56 }
  0x94   : > { %v359_v1 = vshrl.u32 (!%p1534_p6), %v358_v0, 7 }
  0x95   : > { %s349_s30 = scalar_lea.vmem %s3207_s9, %s3234_s4 }
  0x96   : > { %v360_v3 = vsub.s32 (!%p1534_p6), 0, %v359_v1  ;;  %v364_v4 = vsub.s32 (!%p1534_p6), 1, %v359_v1  ;;  %v368_v5 = vsub.s32 (!%p1534_p6), 2, %v359_v1 }
  0x98   : > { %v356_v2 = vld [vmem:[%s3208_s18] sm:$0x7] (!%p1534_p6) }
  0x99   : > { %v361_v6 = vrot.slane (!%p1534_p6), %v356_v2, %v360_v3  ;;  %v365_v7 = vrot.slane (!%p1534_p6), %v356_v2, %v364_v4  ;;  %v369_v8 = vrot.slane (!%p1534_p6), %v356_v2, %v368_v5 }
  0x9b   : > { %373 = vst [vmem:[#allocation2] sm:$0xff] %v361_v6  ;;  %374 = vst [vmem:[#allocation2 + $0x8] sm:$0xff] %v365_v7 }
  0x9c   : > { %375 = vst [vmem:[#allocation2 + $0x10] sm:$0xff] %v369_v8 }
  0x9d PF: > { %v380_v9 = vld [vmem:[%s2659_s11 + $0x8] sm:$0xff]  ;;  %v379_v14 = vld [vmem:[%s2659_s11] sm:$0xff]  ;;  %v2356_v16 = vmov 0.0   ;;  %p1535_p5 = scmp.ne.s32.totalorder %s2330_s24, 2 }
  0x9e   : > { %v384_v10 = vld [vmem:[%s2659_s11 + $0x28] sm:$0xff]  ;;  %v383_v15 = vld [vmem:[%s2659_s11 + $0x20] sm:$0xff]  ;;  %728 = vmatprep.mubr.f32.mxu1 %v2356_v16 }
  0x9f   : > { %v508_v11 = vld [vmem:[%s2659_s11 + $0x408] sm:$0xff]  ;;  %v1610_v12 = vpack.c.bf16 %v384_v10, %v380_v9  ;;  %v1612_v18 = vpack.c.bf16 %v383_v15, %v379_v14  ;;  %v507_v19 = vld [vmem:[%s2659_s11 + $0x400] sm:$0xff] }
  0xa0   : > { %v512_v13 = vld [vmem:[%s2659_s11 + $0x428] sm:$0xff]  ;;  %v511_v20 = vld [vmem:[%s2659_s11 + $0x420] sm:$0xff] }
  0xa1   : > { %v1674_v17 = vpack.c.bf16 %v512_v13, %v508_v11  ;;  %v388_v21 = vld [vmem:[%s2659_s11 + $0x48] sm:$0xff]  ;;  %1611 = vmatprep.subr.bf16.mxu0 %v1610_v12  ;;  %v1676_v22 = vpack.c.bf16 %v511_v20, %v507_v19  ;;  %v387_v28 = vld [vmem:[%s2659_s11 + $0x40] sm:$0xff] }
  0xa2   : > { %v392_v23 = vld [vmem:[%s2659_s11 + $0x68] sm:$0xff]  ;;  %1613 = vmatpush1.bf16.msra.mxu0 %v1612_v18  ;;  %v391_v29 = vld [vmem:[%s2659_s11 + $0x60] sm:$0xff] }
  0xa3   : > { %v516_v24 = vld [vmem:[%s2659_s11 + $0x448] sm:$0xff]  ;;  %1675 = vmatprep.subr.bf16.mxu1 %v1674_v17  ;;  %v1614_v26 = vpack.c.bf16 %v392_v23, %v388_v21  ;;  %v515_v30 = vld [vmem:[%s2659_s11 + $0x440] sm:$0xff]  ;;  %v1616_v31 = vpack.c.bf16 %v391_v29, %v387_v28 }
  0xa4   : > { %v520_v25 = vld [vmem:[%s2659_s11 + $0x468] sm:$0xff]  ;;  %1677 = vmatpush1.bf16.msra.mxu1 %v1676_v22  ;;  %v519_v32 = vld [vmem:[%s2659_s11 + $0x460] sm:$0xff] }
  0xa5   : > { %v1678_v27 = vpack.c.bf16 %v520_v25, %v516_v24  ;;  %v396_v33 = vld [vmem:[%s2659_s11 + $0x88] sm:$0xff]  ;;  %1615 = vmatprep.subr.bf16.mxu0 %v1614_v26  ;;  %v1680_v35 = vpack.c.bf16 %v519_v32, %v515_v30  ;;  %v395_v39 = vld [vmem:[%s2659_s11 + $0x80] sm:$0xff] }
  0xa6   : > { %v400_v34 = vld [vmem:[%s2659_s11 + $0xa8] sm:$0xff]  ;;  %v399_v41 = vld [vmem:[%s2659_s11 + $0xa0] sm:$0xff]  ;;  %1617 = vmatpush1.bf16.msra.mxu0 %v1616_v31 }
  0xa7   : > { %1679 = vmatprep.subr.bf16.mxu1 %v1678_v27  ;;  %v1618_v36 = vpack.c.bf16 %v400_v34, %v396_v33  ;;  %v524_v37 = vld [vmem:[%s2659_s11 + $0x488] sm:$0xff]  ;;  %v523_v42 = vld [vmem:[%s2659_s11 + $0x480] sm:$0xff]  ;;  %v1620_v44 = vpack.c.bf16 %v399_v41, %v395_v39 }
  0xa8   : > { %v528_v38 = vld [vmem:[%s2659_s11 + $0x4a8] sm:$0xff]  ;;  %v527_v43 = vld [vmem:[%s2659_s11 + $0x4a0] sm:$0xff]  ;;  %1681 = vmatpush1.bf16.msra.mxu1 %v1680_v35 }
  0xa9   : > { %v1682_v40 = vpack.c.bf16 %v528_v38, %v524_v37  ;;  %v404_v45 = vld [vmem:[%s2659_s11 + $0xc8] sm:$0xff]  ;;  %1619 = vmatprep.subr.bf16.mxu0 %v1618_v36  ;;  %v1684_v48 = vpack.c.bf16 %v527_v43, %v523_v42  ;;  %v403_v51 = vld [vmem:[%s2659_s11 + $0xc0] sm:$0xff]  ;;  %v382_v43 = vld [vmem:[%s2659_s11 + $0x18] sm:$0xff] }
  0xaa   : > { %v408_v46 = vld [vmem:[%s2659_s11 + $0xe8] sm:$0xff]  ;;  %v407_v52 = vld [vmem:[%s2659_s11 + $0xe0] sm:$0xff]  ;;  %1621 = vmatpush1.bf16.msra.mxu0 %v1620_v44  ;;  %v386_v44 = vld [vmem:[%s2659_s11 + $0x38] sm:$0xff] }
  0xab   : > { %v532_v47 = vld [vmem:[%s2659_s11 + $0x4c8] sm:$0xff]  ;;  %v1622_v49 = vpack.c.bf16 %v408_v46, %v404_v45  ;;  %1683 = vmatprep.subr.bf16.mxu1 %v1682_v40  ;;  %v531_v54 = vld [vmem:[%s2659_s11 + $0x4c0] sm:$0xff]  ;;  %v1624_v60 = vpack.c.bf16 %v407_v52, %v403_v51  ;;  %v1706_v51 = vpack.c.bf16 %v386_v44, %v382_v43  ;;  %v385_v52 = vld [vmem:[%s2659_s11 + $0x30] sm:$0xff] }
  0xac   : > { %v536_v50 = vld [vmem:[%s2659_s11 + $0x4e8] sm:$0xff]  ;;  %v535_v55 = vld [vmem:[%s2659_s11 + $0x4e0] sm:$0xff]  ;;  %1685 = vmatpush1.bf16.msra.mxu1 %v1684_v48  ;;  %v426_v43 = vld [vmem:[%s2659_s11 + $0x178] sm:$0xff] }
  0xad   : > { %v1686_v53 = vpack.c.bf16 %v536_v50, %v532_v47  ;;  %v412_v56 = vld [vmem:[%s2659_s11 + $0x108] sm:$0xff]  ;;  %1623 = vmatprep.subr.bf16.mxu0 %v1622_v49  ;;  %v1688_v61 = vpack.c.bf16 %v535_v55, %v531_v54  ;;  %v411_v63 = vld [vmem:[%s2659_s11 + $0x100] sm:$0xff]  ;;  %v381_v50 = vld [vmem:[%s2659_s11 + $0x10] sm:$0xff] }
  0xae   : > { %v416_v57 = vld [vmem:[%s2659_s11 + $0x128] sm:$0xff]  ;;  %v415_v0 = vld [vmem:[%s2659_s11 + $0x120] sm:$0xff]  ;;  %1625 = vmatpush1.bf16.msra.mxu0 %v1624_v60  ;;  %v390_v55 = vld [vmem:[%s2659_s11 + $0x58] sm:$0xff] }
  0xaf   : > { %v540_v58 = vld [vmem:[%s2659_s11 + $0x508] sm:$0xff]  ;;  %v1626_v62 = vpack.c.bf16 %v416_v57, %v412_v56  ;;  %v539_v1 = vld [vmem:[%s2659_s11 + $0x500] sm:$0xff]  ;;  %1687 = vmatprep.subr.bf16.mxu1 %v1686_v53  ;;  %v1628_v8 = vpack.c.bf16 %v415_v0, %v411_v63  ;;  %v394_v56 = vld [vmem:[%s2659_s11 + $0x78] sm:$0xff] }
  0xb0   : > { %v544_v59 = vld [vmem:[%s2659_s11 + $0x528] sm:$0xff]  ;;  %v543_v3 = vld [vmem:[%s2659_s11 + $0x520] sm:$0xff]  ;;  %1689 = vmatpush1.bf16.msra.mxu1 %v1688_v61  ;;  %v389_v63 = vld [vmem:[%s2659_s11 + $0x50] sm:$0xff]  ;;  %v1710_v0 = vpack.c.bf16 %v394_v56, %v390_v55 }
  0xb1   : > { %v1690_v2 = vpack.c.bf16 %v544_v59, %v540_v58  ;;  %v420_v4 = vld [vmem:[%s2659_s11 + $0x148] sm:$0xff]  ;;  %1627 = vmatprep.subr.bf16.mxu0 %v1626_v62  ;;  %v1692_v9 = vpack.c.bf16 %v543_v3, %v539_v1  ;;  %v419_v11 = vld [vmem:[%s2659_s11 + $0x140] sm:$0xff]  ;;  %v1708_v59 = vpack.c.bf16 %v385_v52, %v381_v50  ;;  %v393_v1 = vld [vmem:[%s2659_s11 + $0x70] sm:$0xff] }
  0xb2   : > { %v424_v5 = vld [vmem:[%s2659_s11 + $0x168] sm:$0xff]  ;;  %v423_v12 = vld [vmem:[%s2659_s11 + $0x160] sm:$0xff]  ;;  %1629 = vmatpush1.bf16.msra.mxu0 %v1628_v8  ;;  %v434_v55 = vld [vmem:[%s2659_s11 + $0x1b8] sm:$0xff] }
  0xb3   : > { %v548_v6 = vld [vmem:[%s2659_s11 + $0x548] sm:$0xff]  ;;  %v1630_v10 = vpack.c.bf16 %v424_v5, %v420_v4  ;;  %v547_v13 = vld [vmem:[%s2659_s11 + $0x540] sm:$0xff]  ;;  %1691 = vmatprep.subr.bf16.mxu1 %v1690_v2  ;;  %v1632_v21 = vpack.c.bf16 %v423_v12, %v419_v11  ;;  %v398_v4 = vld [vmem:[%s2659_s11 + $0x98] sm:$0xff] }
  0xb4   : > { %v552_v7 = vld [vmem:[%s2659_s11 + $0x568] sm:$0xff]  ;;  %v551_v15 = vld [vmem:[%s2659_s11 + $0x560] sm:$0xff]  ;;  %1693 = vmatpush1.bf16.msra.mxu1 %v1692_v9  ;;  %v402_v5 = vld [vmem:[%s2659_s11 + $0xb8] sm:$0xff] }
  0xb5   : > { %v1694_v14 = vpack.c.bf16 %v552_v7, %v548_v6  ;;  %v428_v17 = vld [vmem:[%s2659_s11 + $0x188] sm:$0xff]  ;;  %1631 = vmatprep.subr.bf16.mxu0 %v1630_v10  ;;  %v1696_v22 = vpack.c.bf16 %v551_v15, %v547_v13  ;;  %v427_v24 = vld [vmem:[%s2659_s11 + $0x180] sm:$0xff]  ;;  %v1712_v7 = vpack.c.bf16 %v393_v1, %v389_v63  ;;  %v397_v11 = vld [vmem:[%s2659_s11 + $0x90] sm:$0xff]  ;;  %v1714_v12 = vpack.c.bf16 %v402_v5, %v398_v4 }
  0xb6   : > { %v432_v18 = vld [vmem:[%s2659_s11 + $0x1a8] sm:$0xff]  ;;  %v431_v25 = vld [vmem:[%s2659_s11 + $0x1a0] sm:$0xff]  ;;  %1633 = vmatpush1.bf16.msra.mxu0 %v1632_v21  ;;  %v401_v13 = vld [vmem:[%s2659_s11 + $0xb0] sm:$0xff] }
  0xb7   : > { %v556_v19 = vld [vmem:[%s2659_s11 + $0x588] sm:$0xff]  ;;  %v1634_v23 = vpack.c.bf16 %v432_v18, %v428_v17  ;;  %v555_v26 = vld [vmem:[%s2659_s11 + $0x580] sm:$0xff]  ;;  %1695 = vmatprep.subr.bf16.mxu1 %v1694_v14  ;;  %v1636_v33 = vpack.c.bf16 %v431_v25, %v427_v24  ;;  %v406_v17 = vld [vmem:[%s2659_s11 + $0xd8] sm:$0xff] }
  0xb8   : > { %v560_v20 = vld [vmem:[%s2659_s11 + $0x5a8] sm:$0xff]  ;;  %v559_v28 = vld [vmem:[%s2659_s11 + $0x5a0] sm:$0xff]  ;;  %1697 = vmatpush1.bf16.msra.mxu1 %v1696_v22  ;;  %v410_v18 = vld [vmem:[%s2659_s11 + $0xf8] sm:$0xff] }
  0xb9   : > { %v1698_v27 = vpack.c.bf16 %v560_v20, %v556_v19  ;;  %v436_v29 = vld [vmem:[%s2659_s11 + $0x1c8] sm:$0xff]  ;;  %1635 = vmatprep.subr.bf16.mxu0 %v1634_v23  ;;  %v1700_v34 = vpack.c.bf16 %v559_v28, %v555_v26  ;;  %v435_v36 = vld [vmem:[%s2659_s11 + $0x1c0] sm:$0xff]  ;;  %v1716_v20 = vpack.c.bf16 %v401_v13, %v397_v11  ;;  %v405_v24 = vld [vmem:[%s2659_s11 + $0xd0] sm:$0xff]  ;;  %v1718_v25 = vpack.c.bf16 %v410_v18, %v406_v17 }
  0xba   : > { %v440_v30 = vld [vmem:[%s2659_s11 + $0x1e8] sm:$0xff]  ;;  %v439_v37 = vld [vmem:[%s2659_s11 + $0x1e0] sm:$0xff]  ;;  %1637 = vmatpush1.bf16.msra.mxu0 %v1636_v33  ;;  %v409_v26 = vld [vmem:[%s2659_s11 + $0xf0] sm:$0xff] }
  0xbb   : > { %v564_v31 = vld [vmem:[%s2659_s11 + $0x5c8] sm:$0xff]  ;;  %v1638_v35 = vpack.c.bf16 %v440_v30, %v436_v29  ;;  %v563_v38 = vld [vmem:[%s2659_s11 + $0x5c0] sm:$0xff]  ;;  %1699 = vmatprep.subr.bf16.mxu1 %v1698_v27  ;;  %v1640_v45 = vpack.c.bf16 %v439_v37, %v435_v36  ;;  %v414_v29 = vld [vmem:[%s2659_s11 + $0x118] sm:$0xff]  ;;  %v1720_v33 = vpack.c.bf16 %v409_v26, %v405_v24 }
  0xbc   : > { %v568_v32 = vld [vmem:[%s2659_s11 + $0x5e8] sm:$0xff]  ;;  %v567_v40 = vld [vmem:[%s2659_s11 + $0x5e0] sm:$0xff]  ;;  %1701 = vmatpush1.bf16.msra.mxu1 %v1700_v34  ;;  %v418_v30 = vld [vmem:[%s2659_s11 + $0x138] sm:$0xff] }
  0xbd   : > { %v1702_v39 = vpack.c.bf16 %v568_v32, %v564_v31  ;;  %v444_v41 = vld [vmem:[%s2659_s11 + $0x208] sm:$0xff]  ;;  %1639 = vmatprep.subr.bf16.mxu0 %v1638_v35  ;;  %v1704_v46 = vpack.c.bf16 %v567_v40, %v563_v38  ;;  %v443_v48 = vld [vmem:[%s2659_s11 + $0x200] sm:$0xff]  ;;  %v377_v31 = vld [vmem:[%s2651_s13 + $0x8] sm:$0xff]  ;;  %v1722_v38 = vpack.c.bf16 %v418_v30, %v414_v29 }
  0xbe   : > { %v448_v42 = vld [vmem:[%s2659_s11 + $0x228] sm:$0xff]  ;;  %v447_v49 = vld [vmem:[%s2659_s11 + $0x220] sm:$0xff]  ;;  %1641 = vmatpush1.bf16.msra.mxu0 %v1640_v45  ;;  %657 = vmatprep.mubr.f32.mxu0 %v377_v31  ;;  %v413_v37 = vld [vmem:[%s2659_s11 + $0x110] sm:$0xff] }
  0xbf   : > { %v1642_v47 = vpack.c.bf16 %v448_v42, %v444_v41  ;;  %1703 = vmatprep.subr.bf16.mxu1 %v1702_v39  ;;  %v452_v53 = vld [vmem:[%s2659_s11 + $0x248] sm:$0xff]  ;;  %v2758_v57 = vld [vmem:[%s2651_s13 + $0x10] sm:$0xff]  ;;  %v1644_v58 = vpack.c.bf16 %v447_v49, %v443_v48  ;;  %v417_v39 = vld [vmem:[%s2659_s11 + $0x130] sm:$0xff] }
  0xc0   : > { %v456_v54 = vld [vmem:[%s2659_s11 + $0x268] sm:$0xff]  ;;  %1705 = vmatpush1.bf16.msra.mxu1 %v1704_v46  ;;  %v451_v61 = vld [vmem:[%s2659_s11 + $0x240] sm:$0xff]  ;;  %v422_v42 = vld [vmem:[%s2659_s11 + $0x158] sm:$0xff]  ;;  %v1724_v45 = vpack.c.bf16 %v417_v39, %v413_v37 }
  0xc1   : > { %1643 = vmatprep.subr.bf16.mxu0 %v1642_v47  ;;  %v1646_v60 = vpack.c.bf16 %v456_v54, %v452_v53  ;;  %v455_v62 = vld [vmem:[%s2659_s11 + $0x260] sm:$0xff]  ;;  %1707 = vmatprep.subr.bf16.mxu1 %v1706_v51  ;;  %v460_v2 = vld [vmem:[%s2659_s11 + $0x288] sm:$0xff]  ;;  %v421_v49 = vld [vmem:[%s2659_s11 + $0x150] sm:$0xff]  ;;  %v1726_v50 = vpack.c.bf16 %v426_v43, %v422_v42 }
  0xc2   : > { %v464_v3 = vld [vmem:[%s2659_s11 + $0x2a8] sm:$0xff]  ;;  %1645 = vmatpush1.bf16.msra.mxu0 %v1644_v58  ;;  %v1648_v6 = vpack.c.bf16 %v455_v62, %v451_v61  ;;  %v459_v9 = vld [vmem:[%s2659_s11 + $0x280] sm:$0xff]  ;;  %v425_v51 = vld [vmem:[%s2659_s11 + $0x170] sm:$0xff] }
  0xc3   : > { %729 = vmatmul.mubr.f32.vlgmr.msra.gmra.mrb[0].mxu1 %v2758_v57  ;;  %1647 = vmatprep.subr.bf16.mxu0 %v1646_v60  ;;  %v1650_v8 = vpack.c.bf16 %v464_v3, %v460_v2  ;;  %v463_v10 = vld [vmem:[%s2659_s11 + $0x2a0] sm:$0xff]  ;;  %v468_v14 = vld [vmem:[%s2659_s11 + $0x2c8] sm:$0xff]  ;;  %v430_v54 = vld [vmem:[%s2659_s11 + $0x198] sm:$0xff]  ;;  %v1728_v58 = vpack.c.bf16 %v425_v51, %v421_v49 }
  0xc4   : > { %1709 = vmatpush1.bf16.msra.mxu1 %v1708_v59  ;;  %v472_v15 = vld [vmem:[%s2659_s11 + $0x2e8] sm:$0xff]  ;;  %v1652_v19 = vpack.c.bf16 %v463_v10, %v459_v9  ;;  %v467_v22 = vld [vmem:[%s2659_s11 + $0x2c0] sm:$0xff]  ;;  %799 = vmatprep.mubr.f32.mxu1 %v377_v31  ;;  %v429_v62 = vld [vmem:[%s2659_s11 + $0x190] sm:$0xff]  ;;  %v1730_v63 = vpack.c.bf16 %v434_v55, %v430_v54 }
  0xc5   : > { %1711 = vmatprep.subr.bf16.mxu1 %v1710_v0  ;;  %v1654_v21 = vpack.c.bf16 %v472_v15, %v468_v14  ;;  %v471_v23 = vld [vmem:[%s2659_s11 + $0x2e0] sm:$0xff]  ;;  %v476_v27 = vld [vmem:[%s2659_s11 + $0x308] sm:$0xff]  ;;  %v433_v0 = vld [vmem:[%s2659_s11 + $0x1b0] sm:$0xff] }
  0xc6   : > { %1649 = vmatpush1.bf16.msra.mxu0 %v1648_v6  ;;  %v480_v28 = vld [vmem:[%s2659_s11 + $0x328] sm:$0xff]  ;;  %v1656_v32 = vpack.c.bf16 %v471_v23, %v467_v22  ;;  %v475_v35 = vld [vmem:[%s2659_s11 + $0x300] sm:$0xff]  ;;  %v438_v3 = vld [vmem:[%s2659_s11 + $0x1d8] sm:$0xff]  ;;  %v1732_v6 = vpack.c.bf16 %v433_v0, %v429_v62 }
  0xc7   : > { %1651 = vmatprep.subr.bf16.mxu0 %v1650_v8  ;;  %v1658_v34 = vpack.c.bf16 %v480_v28, %v476_v27  ;;  %v479_v36 = vld [vmem:[%s2659_s11 + $0x320] sm:$0xff]  ;;  %v484_v40 = vld [vmem:[%s2659_s11 + $0x348] sm:$0xff]  ;;  %v442_v4 = vld [vmem:[%s2659_s11 + $0x1f8] sm:$0xff] }
  0xc8   : > { %1713 = vmatpush1.bf16.msra.mxu1 %v1712_v7  ;;  %v488_v41 = vld [vmem:[%s2659_s11 + $0x368] sm:$0xff]  ;;  %v1660_v44 = vpack.c.bf16 %v479_v36, %v475_v35  ;;  %v483_v47 = vld [vmem:[%s2659_s11 + $0x340] sm:$0xff]  ;;  %v1734_v10 = vpack.c.bf16 %v442_v4, %v438_v3  ;;  %v437_v11 = vld [vmem:[%s2659_s11 + $0x1d0] sm:$0xff] }
  0xc9   : > { %1715 = vmatprep.subr.bf16.mxu1 %v1714_v12  ;;  %v1662_v46 = vpack.c.bf16 %v488_v41, %v484_v40  ;;  %v487_v48 = vld [vmem:[%s2659_s11 + $0x360] sm:$0xff]  ;;  %v492_v52 = vld [vmem:[%s2659_s11 + $0x388] sm:$0xff]  ;;  %v441_v12 = vld [vmem:[%s2659_s11 + $0x1f0] sm:$0xff] }
  0xca   : > { %1653 = vmatpush1.bf16.msra.mxu0 %v1652_v19  ;;  %v496_v53 = vld [vmem:[%s2659_s11 + $0x3a8] sm:$0xff]  ;;  %v1664_v56 = vpack.c.bf16 %v487_v48, %v483_v47  ;;  %v491_v60 = vld [vmem:[%s2659_s11 + $0x380] sm:$0xff]  ;;  %v446_v13 = vld [vmem:[%s2659_s11 + $0x218] sm:$0xff]  ;;  %v1736_v17 = vpack.c.bf16 %v441_v12, %v437_v11 }
  0xcb   : > { %1655 = vmatprep.subr.bf16.mxu0 %v1654_v21  ;;  %v1666_v59 = vpack.c.bf16 %v496_v53, %v492_v52  ;;  %v495_v61 = vld [vmem:[%s2659_s11 + $0x3a0] sm:$0xff]  ;;  %v500_v1 = vld [vmem:[%s2659_s11 + $0x3c8] sm:$0xff]  ;;  %v450_v14 = vld [vmem:[%s2659_s11 + $0x238] sm:$0xff] }
  0xcc   : > { %1717 = vmatpush1.bf16.msra.mxu1 %v1716_v20  ;;  %v504_v2 = vld [vmem:[%s2659_s11 + $0x3e8] sm:$0xff]  ;;  %v1668_v5 = vpack.c.bf16 %v495_v61, %v491_v60  ;;  %v499_v8 = vld [vmem:[%s2659_s11 + $0x3c0] sm:$0xff]  ;;  %v1738_v18 = vpack.c.bf16 %v450_v14, %v446_v13  ;;  %v445_v19 = vld [vmem:[%s2659_s11 + $0x210] sm:$0xff] }
  0xcd   : > { %1719 = vmatprep.subr.bf16.mxu1 %v1718_v25  ;;  %v1670_v7 = vpack.c.bf16 %v504_v2, %v500_v1  ;;  %v503_v9 = vld [vmem:[%s2659_s11 + $0x3e0] sm:$0xff]  ;;  %v449_v20 = vld [vmem:[%s2659_s11 + $0x230] sm:$0xff]  ;;  %v454_v21 = vld [vmem:[%s2659_s11 + $0x258] sm:$0xff] }
  0xce   : > { %1657 = vmatpush1.bf16.msra.mxu0 %v1656_v32  ;;  %v1672_v15 = vpack.c.bf16 %v503_v9, %v499_v8  ;;  %v458_v22 = vld [vmem:[%s2659_s11 + $0x278] sm:$0xff]  ;;  %v2821_v23 = vld [vmem:[%s2651_s13] sm:$0xff]  ;;  %v1740_v26 = vpack.c.bf16 %v449_v20, %v445_v19  ;;  %v888_v30 = vld [vmem:[%s2672_s25 + $0x20] sm:$0xff] }
  0xcf   : > { %1659 = vmatprep.subr.bf16.mxu0 %v1658_v34  ;;  %v453_v24 = vld [vmem:[%s2659_s11 + $0x250] sm:$0xff]  ;;  %v462_v27 = vld [vmem:[%s2659_s11 + $0x298] sm:$0xff]  ;;  %v885_v29 = vld [vmem:[%s2672_s25 + $0x8] sm:$0xff]  ;;  %v1742_v32 = vpack.c.bf16 %v458_v22, %v454_v21 }
  0xd0   : > { %1721 = vmatpush1.bf16.msra.mxu1 %v1720_v33  ;;  %v457_v25 = vld [vmem:[%s2659_s11 + $0x270] sm:$0xff]  ;;  %v466_v28 = vld [vmem:[%s2659_s11 + $0x2b8] sm:$0xff]  ;;  %v884_v31 = vld [vmem:[%s2672_s25] sm:$0xff]  ;;  %v1802_v33 = vpack.c.bf16 %v888_v30, %v885_v29 }
  0xd1   : > { %1723 = vmatprep.subr.bf16.mxu1 %v1722_v38  ;;  %v887_v34 = vld [vmem:[%s2672_s25 + $0x18] sm:$0xff]  ;;  %v894_v36 = vld [vmem:[%s2672_s25 + $0x50] sm:$0xff]  ;;  %v893_v40 = vld [vmem:[%s2672_s25 + $0x48] sm:$0xff]  ;;  %v1744_v43 = vpack.c.bf16 %v457_v25, %v453_v24  ;;  %v1746_v47 = vpack.c.bf16 %v466_v28, %v462_v27 }
  0xd2   : > { %1661 = vmatpush1.bf16.msra.mxu0 %v1660_v44  ;;  %v891_v35 = vld [vmem:[%s2672_s25 + $0x38] sm:$0xff]  ;;  %v1804_v37 = vpack.c.bf16 %v887_v34, %v884_v31  ;;  %v890_v39 = vld [vmem:[%s2672_s25 + $0x30] sm:$0xff]  ;;  %v897_v41 = vld [vmem:[%s2672_s25 + $0x68] sm:$0xff] }
  0xd3   : > { %1663 = vmatprep.subr.bf16.mxu0 %v1662_v46  ;;  %v1806_v38 = vpack.c.bf16 %v894_v36, %v891_v35  ;;  %v900_v42 = vld [vmem:[%s2672_s25 + $0x80] sm:$0xff]  ;;  %v461_v44 = vld [vmem:[%s2659_s11 + $0x290] sm:$0xff]  ;;  %v1808_v46 = vpack.c.bf16 %v893_v40, %v890_v39  ;;  %v470_v48 = vld [vmem:[%s2659_s11 + $0x2d8] sm:$0xff] }
  0xd4   : > { %1725 = vmatpush1.bf16.msra.mxu1 %v1724_v45  ;;  %v465_v45 = vld [vmem:[%s2659_s11 + $0x2b0] sm:$0xff]  ;;  %v1810_v49 = vpack.c.bf16 %v900_v42, %v897_v41  ;;  %v899_v51 = vld [vmem:[%s2672_s25 + $0x78] sm:$0xff]  ;;  %v905_v0 = vld [vmem:[%s2672_s25 + $0xa8] sm:$0xff] }
  0xd5   : > { %1727 = vmatprep.subr.bf16.mxu1 %v1726_v50  ;;  %v896_v50 = vld [vmem:[%s2672_s25 + $0x60] sm:$0xff]  ;;  %v474_v52 = vld [vmem:[%s2659_s11 + $0x2f8] sm:$0xff]  ;;  %v906_v54 = vld [vmem:[%s2672_s25 + $0xb0] sm:$0xff]  ;;  %v1748_v55 = vpack.c.bf16 %v465_v45, %v461_v44 }
  0xd6   : > { %1665 = vmatpush1.bf16.msra.mxu0 %v1664_v56  ;;  %v903_v53 = vld [vmem:[%s2672_s25 + $0x98] sm:$0xff]  ;;  %v469_v56 = vld [vmem:[%s2659_s11 + $0x2d0] sm:$0xff]  ;;  %v1750_v60 = vpack.c.bf16 %v474_v52, %v470_v48  ;;  %v909_v2 = vld [vmem:[%s2672_s25 + $0xc8] sm:$0xff] }
  0xd7   : > { %1667 = vmatprep.subr.bf16.mxu0 %v1666_v59  ;;  %v1812_v59 = vpack.c.bf16 %v899_v51, %v896_v50  ;;  %v478_v61 = vld [vmem:[%s2659_s11 + $0x318] sm:$0xff]  ;;  %v1814_v62 = vpack.c.bf16 %v906_v54, %v903_v53  ;;  %v912_v3 = vld [vmem:[%s2672_s25 + $0xe0] sm:$0xff]  ;;  %v489_v21 = vld [vmem:[%s2659_s11 + $0x370] sm:$0xff] }
  0xd8   : > { %1729 = vmatpush1.bf16.msra.mxu1 %v1728_v58  ;;  %v473_v58 = vld [vmem:[%s2659_s11 + $0x2f0] sm:$0xff]  ;;  %v482_v1 = vld [vmem:[%s2659_s11 + $0x338] sm:$0xff]  ;;  %v908_v11 = vld [vmem:[%s2672_s25 + $0xc0] sm:$0xff] }
  0xd9   : > { %1731 = vmatprep.subr.bf16.mxu1 %v1730_v63  ;;  %v902_v63 = vld [vmem:[%s2672_s25 + $0x90] sm:$0xff]  ;;  %v1752_v4 = vpack.c.bf16 %v473_v58, %v469_v56  ;;  %v1754_v8 = vpack.c.bf16 %v482_v1, %v478_v61  ;;  %v486_v9 = vld [vmem:[%s2659_s11 + $0x358] sm:$0xff]  ;;  %v917_v25 = vld [vmem:[%s2672_s25 + $0x108] sm:$0xff] }
  0xda   : > { %1669 = vmatpush1.bf16.msra.mxu0 %v1668_v5  ;;  %v477_v5 = vld [vmem:[%s2659_s11 + $0x310] sm:$0xff]  ;;  %v911_v12 = vld [vmem:[%s2672_s25 + $0xd8] sm:$0xff] }
  0xdb   : > { %1671 = vmatprep.subr.bf16.mxu0 %v1670_v7  ;;  %v1816_v7 = vpack.c.bf16 %v905_v0, %v902_v63  ;;  %v490_v13 = vld [vmem:[%s2659_s11 + $0x378] sm:$0xff]  ;;  %v1820_v19 = vpack.c.bf16 %v911_v12, %v908_v11  ;;  %v914_v24 = vld [vmem:[%s2672_s25 + $0xf0] sm:$0xff]  ;;  %v921_v12 = vld [vmem:[%s2672_s25 + $0x128] sm:$0xff] }
  0xdc   : > { %1733 = vmatpush1.bf16.msra.mxu1 %v1732_v6  ;;  %v481_v6 = vld [vmem:[%s2659_s11 + $0x330] sm:$0xff]  ;;  %v915_v14 = vld [vmem:[%s2672_s25 + $0xf8] sm:$0xff]  ;;  %v1758_v20 = vpack.c.bf16 %v490_v13, %v486_v9  ;;  %v1824_v29 = vpack.c.bf16 %v917_v25, %v914_v24  ;;  %v924_v13 = vld [vmem:[%s2672_s25 + $0x140] sm:$0xff] }
  0xdd   : > { %1735 = vmatprep.subr.bf16.mxu1 %v1734_v10  ;;  %v1818_v10 = vpack.c.bf16 %v912_v3, %v909_v2  ;;  %v498_v27 = vld [vmem:[%s2659_s11 + $0x3b8] sm:$0xff]  ;;  %v493_v31 = vld [vmem:[%s2659_s11 + $0x390] sm:$0xff] }
  0xde   : > { %1673 = vmatpush1.bf16.msra.mxu0 %v1672_v15  ;;  %v918_v15 = vld [vmem:[%s2672_s25 + $0x110] sm:$0xff]  ;;  %v506_v34 = vld [vmem:[%s2659_s11 + $0x3f8] sm:$0xff] }
  0xdf   : > { %1803 = vmatprep.subr.bf16.mxu0 %v1802_v33  ;;  %v1822_v22 = vpack.c.bf16 %v918_v15, %v915_v14  ;;  %v502_v33 = vld [vmem:[%s2659_s11 + $0x3d8] sm:$0xff]  ;;  %v513_v44 = vld [vmem:[%s2659_s11 + $0x430] sm:$0xff]  ;;  %v1826_v15 = vpack.c.bf16 %v924_v13, %v921_v12  ;;  %v957_v12 = vld [vmem:[%s2672_s25 + $0x248] sm:$0xff] }
  0xe0   : > { %1737 = vmatpush1.bf16.msra.mxu1 %v1736_v17  ;;  %v1756_v17 = vpack.c.bf16 %v481_v6, %v477_v5  ;;  %v1766_v36 = vpack.c.bf16 %v506_v34, %v502_v33  ;;  %v510_v39 = vld [vmem:[%s2659_s11 + $0x418] sm:$0xff]  ;;  %v521_v50 = vld [vmem:[%s2659_s11 + $0x470] sm:$0xff]  ;;  %v933_v33 = vld [vmem:[%s2672_s25 + $0x188] sm:$0xff] }
  0xe1   : > { %1739 = vmatprep.subr.bf16.mxu1 %v1738_v18  ;;  %658 = vmatmul.mubr.f32.vlgmr.msra.gmra.mrb[0].mxu0 %v2821_v23  ;;  %v485_v18 = vld [vmem:[%s2659_s11 + $0x350] sm:$0xff]  ;;  %v514_v40 = vld [vmem:[%s2659_s11 + $0x438] sm:$0xff]  ;;  %v936_v34 = vld [vmem:[%s2672_s25 + $0x1a0] sm:$0xff] }
  0xe2   : > { %1805 = vmatpush1.bf16.msra.mxu0 %v1804_v37  ;;  %v1760_v28 = vpack.c.bf16 %v489_v21, %v485_v18  ;;  %v501_v37 = vld [vmem:[%s2659_s11 + $0x3d0] sm:$0xff]  ;;  %v1770_v42 = vpack.c.bf16 %v514_v40, %v510_v39  ;;  %v518_v45 = vld [vmem:[%s2659_s11 + $0x458] sm:$0xff]  ;;  %v932_v39 = vld [vmem:[%s2672_s25 + $0x180] sm:$0xff] }
  0xe3   : > { %1807 = vmatprep.subr.bf16.mxu0 %v1806_v38  ;;  %v505_v38 = vld [vmem:[%s2659_s11 + $0x3f0] sm:$0xff]  ;;  %v526_v51 = vld [vmem:[%s2659_s11 + $0x498] sm:$0xff]  ;;  %v952_v13 = vld [vmem:[%s2672_s25 + $0x220] sm:$0xff] }
  0xe4   : > { %1741 = vmatpush1.bf16.msra.mxu1 %v1740_v26  ;;  %v494_v26 = vld [vmem:[%s2659_s11 + $0x398] sm:$0xff]  ;;  %v1768_v41 = vpack.c.bf16 %v505_v38, %v501_v37  ;;  %v529_v56 = vld [vmem:[%s2659_s11 + $0x4b0] sm:$0xff]  ;;  %v1834_v38 = vpack.c.bf16 %v936_v34, %v933_v33  ;;  %v965_v33 = vld [vmem:[%s2672_s25 + $0x288] sm:$0xff] }
  0xe5   : > { %1743 = vmatprep.subr.bf16.mxu1 %v1742_v32  ;;  %v1762_v30 = vpack.c.bf16 %v498_v27, %v494_v26  ;;  %v497_v32 = vld [vmem:[%s2659_s11 + $0x3b0] sm:$0xff]  ;;  %v530_v52 = vld [vmem:[%s2659_s11 + $0x4b8] sm:$0xff] }
  0xe6   : > { %1809 = vmatpush1.bf16.msra.mxu0 %v1808_v46  ;;  %v1764_v35 = vpack.c.bf16 %v497_v32, %v493_v31  ;;  %v522_v46 = vld [vmem:[%s2659_s11 + $0x478] sm:$0xff]  ;;  %v1778_v54 = vpack.c.bf16 %v530_v52, %v526_v51  ;;  %v533_v61 = vld [vmem:[%s2659_s11 + $0x4d0] sm:$0xff]  ;;  %v929_v32 = vld [vmem:[%s2672_s25 + $0x168] sm:$0xff] }
  0xe7   : > { %1811 = vmatprep.subr.bf16.mxu0 %v1810_v49  ;;  %v1774_v48 = vpack.c.bf16 %v522_v46, %v518_v45  ;;  %v517_v49 = vld [vmem:[%s2659_s11 + $0x450] sm:$0xff]  ;;  %v534_v58 = vld [vmem:[%s2659_s11 + $0x4d8] sm:$0xff]  ;;  %v889_v52 = vld [vmem:[%s2672_s25 + $0x28] sm:$0xff] }
  0xe8   : > { %1745 = vmatpush1.bf16.msra.mxu1 %v1744_v43  ;;  %v509_v43 = vld [vmem:[%s2659_s11 + $0x410] sm:$0xff]  ;;  %v1776_v53 = vpack.c.bf16 %v521_v50, %v517_v49  ;;  %v542_v63 = vld [vmem:[%s2659_s11 + $0x518] sm:$0xff]  ;;  %v941_v49 = vld [vmem:[%s2672_s25 + $0x1c8] sm:$0xff] }
  0xe9   : > { %1747 = vmatprep.subr.bf16.mxu1 %v1746_v47  ;;  %v1772_v47 = vpack.c.bf16 %v513_v44, %v509_v43  ;;  %v541_v2 = vld [vmem:[%s2659_s11 + $0x510] sm:$0xff]  ;;  %v554_v5 = vld [vmem:[%s2659_s11 + $0x578] sm:$0xff] }
  0xea   : > { %1813 = vmatpush1.bf16.msra.mxu0 %v1812_v59  ;;  %v538_v59 = vld [vmem:[%s2659_s11 + $0x4f8] sm:$0xff]  ;;  %v545_v3 = vld [vmem:[%s2659_s11 + $0x530] sm:$0xff] }
  0xeb   : > { %1815 = vmatprep.subr.bf16.mxu0 %v1814_v62  ;;  %v537_v62 = vld [vmem:[%s2659_s11 + $0x4f0] sm:$0xff]  ;;  %v1788_v6 = vpack.c.bf16 %v545_v3, %v541_v2  ;;  %v562_v11 = vld [vmem:[%s2659_s11 + $0x5b8] sm:$0xff]  ;;  %v949_v3 = vld [vmem:[%s2672_s25 + $0x208] sm:$0xff] }
  0xec   : > { %1749 = vmatpush1.bf16.msra.mxu1 %v1748_v55  ;;  %v525_v55 = vld [vmem:[%s2659_s11 + $0x490] sm:$0xff]  ;;  %v1784_v0 = vpack.c.bf16 %v537_v62, %v533_v61  ;;  %v923_v18 = vld [vmem:[%s2672_s25 + $0x138] sm:$0xff]  ;;  %v944_v61 = vld [vmem:[%s2672_s25 + $0x1e0] sm:$0xff] }
  0xed   : > { %1751 = vmatprep.subr.bf16.mxu1 %v1750_v60  ;;  %v1780_v60 = vpack.c.bf16 %v529_v56, %v525_v55  ;;  %v553_v9 = vld [vmem:[%s2659_s11 + $0x570] sm:$0xff]  ;;  %v566_v24 = vld [vmem:[%s2659_s11 + $0x5d8] sm:$0xff]  ;;  %v948_v56 = vld [vmem:[%s2672_s25 + $0x200] sm:$0xff] }
  0xee   : > { %1817 = vmatpush1.bf16.msra.mxu0 %v1816_v7  ;;  %v561_v21 = vld [vmem:[%s2659_s11 + $0x5b0] sm:$0xff]  ;;  %v570_v25 = vld [vmem:[%s2659_s11 + $0x5f8] sm:$0xff] }
  0xef   : > { %1819 = vmatprep.subr.bf16.mxu0 %v1818_v10  ;;  %v558_v10 = vld [vmem:[%s2659_s11 + $0x598] sm:$0xff]  ;;  %v565_v26 = vld [vmem:[%s2659_s11 + $0x5d0] sm:$0xff] }
  0xf0   : > { %1753 = vmatpush1.bf16.msra.mxu1 %v1752_v4  ;;  %v550_v4 = vld [vmem:[%s2659_s11 + $0x558] sm:$0xff]  ;;  %v942_v45 = vld [vmem:[%s2672_s25 + $0x1d0] sm:$0xff] }
  0xf1   : > { %1755 = vmatprep.subr.bf16.mxu1 %v1754_v8  ;;  %v1790_v7 = vpack.c.bf16 %v554_v5, %v550_v4  ;;  %v549_v8 = vld [vmem:[%s2659_s11 + $0x550] sm:$0xff]  ;;  %v927_v27 = vld [vmem:[%s2672_s25 + $0x158] sm:$0xff] }
  0xf2   : > { %1821 = vmatpush1.bf16.msra.mxu0 %v1820_v19  ;;  %v1792_v14 = vpack.c.bf16 %v553_v9, %v549_v8  ;;  %v1794_v19 = vpack.c.bf16 %v562_v11, %v558_v10  ;;  %v935_v40 = vld [vmem:[%s2672_s25 + $0x198] sm:$0xff]  ;;  %v886_v51 = vld [vmem:[%s2672_s25 + $0x10] sm:$0xff]  ;;  %v953_v9 = vld [vmem:[%s2672_s25 + $0x228] sm:$0xff] }
  0xf3   : > { %1823 = vmatprep.subr.bf16.mxu0 %v1822_v22  ;;  %v1836_v43 = vpack.c.bf16 %v935_v40, %v932_v39  ;;  %v939_v44 = vld [vmem:[%s2672_s25 + $0x1b8] sm:$0xff]  ;;  %v946_v2 = vld [vmem:[%s2672_s25 + $0x1f0] sm:$0xff]  ;;  %v901_v11 = vld [vmem:[%s2672_s25 + $0x88] sm:$0xff] }
  0xf4   : > { %1757 = vmatpush1.bf16.msra.mxu1 %v1756_v17  ;;  %v920_v17 = vld [vmem:[%s2672_s25 + $0x120] sm:$0xff]  ;;  %v943_v55 = vld [vmem:[%s2672_s25 + $0x1d8] sm:$0xff]  ;;  %v950_v8 = vld [vmem:[%s2672_s25 + $0x210] sm:$0xff]  ;;  %v1938_v10 = vpack.c.bf16 %v949_v3, %v946_v2 }
  0xf5   : > { %1759 = vmatprep.subr.bf16.mxu1 %v1758_v20  ;;  %v557_v20 = vld [vmem:[%s2659_s11 + $0x590] sm:$0xff]  ;;  %v1828_v22 = vpack.c.bf16 %v923_v18, %v920_v17  ;;  %v947_v62 = vld [vmem:[%s2672_s25 + $0x1f8] sm:$0xff]  ;;  %v904_v18 = vld [vmem:[%s2672_s25 + $0xa0] sm:$0xff] }
  0xf6   : > { %1825 = vmatpush1.bf16.msra.mxu0 %v1824_v29  ;;  %v926_v29 = vld [vmem:[%s2672_s25 + $0x150] sm:$0xff]  ;;  %v1844_v4 = vpack.c.bf16 %v947_v62, %v944_v61  ;;  %v977_v61 = vld [vmem:[%s2672_s25 + $0x2e8] sm:$0xff]  ;;  %v976_v62 = vld [vmem:[%s2672_s25 + $0x2e0] sm:$0xff] }
  0xf7   : > { %1827 = vmatprep.subr.bf16.mxu0 %v1826_v15  ;;  %v1832_v37 = vpack.c.bf16 %v929_v32, %v926_v29  ;;  %v1848_v15 = vpack.c.bf16 %v953_v9, %v950_v8  ;;  %v962_v32 = vld [vmem:[%s2672_s25 + $0x270] sm:$0xff]  ;;  %v981_v3 = vld [vmem:[%s2672_s25 + $0x308] sm:$0xff] }
  0xf8   : > { %1761 = vmatpush1.bf16.msra.mxu1 %v1760_v28  ;;  %v930_v28 = vld [vmem:[%s2672_s25 + $0x170] sm:$0xff]  ;;  %v1856_v39 = vpack.c.bf16 %v965_v33, %v962_v32  ;;  %v1033_v8 = vld [vmem:[%s2672_s25 + $0x4a8] sm:$0xff]  ;;  %v1036_v32 = vld [vmem:[%s2672_s25 + $0x4c0] sm:$0xff] }
  0xf9   : > { %1763 = vmatprep.subr.bf16.mxu1 %v1762_v30  ;;  %v1796_v30 = vpack.c.bf16 %v561_v21, %v557_v20  ;;  %v1830_v31 = vpack.c.bf16 %v930_v28, %v927_v27  ;;  %v956_v20 = vld [vmem:[%s2672_s25 + $0x240] sm:$0xff]  ;;  %v959_v21 = vld [vmem:[%s2672_s25 + $0x258] sm:$0xff]  ;;  %v958_v27 = vld [vmem:[%s2672_s25 + $0x250] sm:$0xff] }
  0xfa   : > { %1829 = vmatpush1.bf16.msra.mxu0 %v1828_v22  ;;  %v961_v28 = vld [vmem:[%s2672_s25 + $0x268] sm:$0xff]  ;;  %v1852_v29 = vpack.c.bf16 %v959_v21, %v956_v20  ;;  %v1039_v33 = vld [vmem:[%s2672_s25 + $0x4d8] sm:$0xff] }
  0xfb   : > { %1831 = vmatprep.subr.bf16.mxu0 %v1830_v31  ;;  %v1946_v34 = vpack.c.bf16 %v961_v28, %v958_v27  ;;  %v987_v27 = vld [vmem:[%s2672_s25 + $0x338] sm:$0xff]  ;;  %v982_v28 = vld [vmem:[%s2672_s25 + $0x310] sm:$0xff] }
  0xfc   : > { %1765 = vmatpush1.bf16.msra.mxu1 %v1764_v35  ;;  %v1798_v35 = vpack.c.bf16 %v570_v25, %v566_v24  ;;  %v907_v24 = vld [vmem:[%s2672_s25 + $0xb8] sm:$0xff] }
  0xfd   : > { %1767 = vmatprep.subr.bf16.mxu1 %v1766_v36  ;;  %v569_v36 = vld [vmem:[%s2659_s11 + $0x5f0] sm:$0xff]  ;;  %v963_v25 = vld [vmem:[%s2672_s25 + $0x278] sm:$0xff] }
  0xfe   : > { %1833 = vmatpush1.bf16.msra.mxu0 %v1832_v37  ;;  %v1800_v46 = vpack.c.bf16 %v569_v36, %v565_v26  ;;  %v966_v26 = vld [vmem:[%s2672_s25 + $0x290] sm:$0xff]  ;;  %v913_v36 = vld [vmem:[%s2672_s25 + $0xe8] sm:$0xff]  ;;  %v964_v37 = vld [vmem:[%s2672_s25 + $0x280] sm:$0xff] }
  0xff   : > { %1835 = vmatprep.subr.bf16.mxu0 %v1834_v38  ;;  %v1854_v31 = vpack.c.bf16 %v966_v26, %v963_v25  ;;  %v967_v38 = vld [vmem:[%s2672_s25 + $0x298] sm:$0xff] }
 0x100   : > { %1769 = vmatpush1.bf16.msra.mxu1 %v1768_v41  ;;  %v934_v41 = vld [vmem:[%s2672_s25 + $0x190] sm:$0xff]  ;;  %v983_v25 = vld [vmem:[%s2672_s25 + $0x318] sm:$0xff] }
 0x101   : > { %1771 = vmatprep.subr.bf16.mxu1 %v1770_v42  ;;  %v937_v42 = vld [vmem:[%s2672_s25 + $0x1a8] sm:$0xff] }
 0x102   : > { %v1930_v50 = vpack.c.bf16 %v937_v42, %v934_v41  ;;  %1837 = vmatpush1.bf16.msra.mxu0 %v1836_v43  ;;  %v1950_v41 = vpack.c.bf16 %v967_v38, %v964_v37  ;;  %v916_v42 = vld [vmem:[%s2672_s25 + $0x100] sm:$0xff]  ;;  %v919_v43 = vld [vmem:[%s2672_s25 + $0x118] sm:$0xff]  ;;  %v989_v37 = vld [vmem:[%s2672_s25 + $0x348] sm:$0xff] }
 0x103   : > { %800 = vmatmul.mubr.f32.vlgmr.msra.gmra.mrb[2].mxu1 %v2821_v23  ;;  %v1782_v23 = vpack.c.bf16 %v538_v59, %v534_v58  ;;  %v1932_v59 = vpack.c.bf16 %v889_v52, %v886_v51  ;;  %v973_v52 = vld [vmem:[%s2672_s25 + $0x2c8] sm:$0xff] }
 0x104   : > { %1773 = vmatpush1.bf16.msra.mxu1 %v1772_v47  ;;  %870 = vmatprep.mubr.f32.mxu1 %v2356_v16  ;;  %v546_v16 = vld [vmem:[%s2659_s11 + $0x538] sm:$0xff]  ;;  %v1838_v47 = vpack.c.bf16 %v942_v45, %v939_v44  ;;  %v969_v44 = vld [vmem:[%s2672_s25 + $0x2a8] sm:$0xff]  ;;  %v972_v45 = vld [vmem:[%s2672_s25 + $0x2c0] sm:$0xff] }
 0x105   : > { %1775 = vmatprep.subr.bf16.mxu1 %v1774_v48  ;;  %v1786_v1 = vpack.c.bf16 %v546_v16, %v542_v63  ;;  %v938_v48 = vld [vmem:[%s2672_s25 + $0x1b0] sm:$0xff]  ;;  %v895_v16 = vld [vmem:[%s2672_s25 + $0x58] sm:$0xff] }
 0x106   : > { %v1840_v58 = vpack.c.bf16 %v941_v49, %v938_v48  ;;  %1839 = vmatprep.subr.bf16.mxu0 %v1838_v47  ;;  %v1858_v47 = vpack.c.bf16 %v972_v45, %v969_v44  ;;  %v968_v48 = vld [vmem:[%s2672_s25 + $0x2a0] sm:$0xff]  ;;  %v971_v49 = vld [vmem:[%s2672_s25 + $0x2b8] sm:$0xff] }
 0x107   : > { %v1860_v51 = vpack.c.bf16 %v971_v49, %v968_v48  ;;  %v991_v44 = vld [vmem:[%s2672_s25 + $0x358] sm:$0xff]  ;;  %v996_v45 = vld [vmem:[%s2672_s25 + $0x380] sm:$0xff] }
 0x108   : > { %1777 = vmatpush1.bf16.msra.mxu1 %v1776_v53  ;;  %v945_v53 = vld [vmem:[%s2672_s25 + $0x1e8] sm:$0xff]  ;;  %1841 = vmatpush1.bf16.msra.mxu0 %v1840_v58  ;;  %v978_v58 = vld [vmem:[%s2672_s25 + $0x2f0] sm:$0xff]  ;;  %v992_v49 = vld [vmem:[%s2672_s25 + $0x360] sm:$0xff] }
 0x109   : > { %1779 = vmatprep.subr.bf16.mxu1 %v1778_v54  ;;  %v940_v54 = vld [vmem:[%s2672_s25 + $0x1c0] sm:$0xff] }
 0x10a   : > { %v1934_v63 = vpack.c.bf16 %v943_v55, %v940_v54  ;;  %v925_v54 = vld [vmem:[%s2672_s25 + $0x148] sm:$0xff] }
 0x10c   : > { %1781 = vmatpush1.bf16.msra.mxu1 %v1780_v60  ;;  %v892_v60 = vld [vmem:[%s2672_s25 + $0x40] sm:$0xff] }
 0x10d   : > { %1783 = vmatprep.subr.bf16.mxu1 %v1782_v23  ;;  %v1842_v23 = vpack.c.bf16 %v948_v56, %v945_v53  ;;  %v1936_v5 = vpack.c.bf16 %v895_v16, %v892_v60  ;;  %v922_v53 = vld [vmem:[%s2672_s25 + $0x130] sm:$0xff]  ;;  %v975_v56 = vld [vmem:[%s2672_s25 + $0x2d8] sm:$0xff] }
 0x10e   : > { %v1862_v60 = vpack.c.bf16 %v978_v58, %v975_v56  ;;  %v979_v16 = vld [vmem:[%s2672_s25 + $0x2f8] sm:$0xff]  ;;  %v997_v56 = vld [vmem:[%s2672_s25 + $0x388] sm:$0xff]  ;;  %v1002_v58 = vld [vmem:[%s2672_s25 + $0x3b0] sm:$0xff] }
 0x10f   : > { %1843 = vmatprep.subr.bf16.mxu0 %v1842_v23  ;;  %v974_v23 = vld [vmem:[%s2672_s25 + $0x2d0] sm:$0xff]  ;;  %v1958_v2 = vpack.c.bf16 %v979_v16, %v976_v62  ;;  %v1001_v62 = vld [vmem:[%s2672_s25 + $0x3a8] sm:$0xff] }
 0x110   : > { %1785 = vmatpush1.bf16.msra.mxu1 %v1784_v0  ;;  %v951_v0 = vld [vmem:[%s2672_s25 + $0x218] sm:$0xff]  ;;  %1845 = vmatpush1.bf16.msra.mxu0 %v1844_v4  ;;  %v984_v4 = vld [vmem:[%s2672_s25 + $0x320] sm:$0xff] }
 0x111   : > { %1787 = vmatprep.subr.bf16.mxu1 %v1786_v1  ;;  %v954_v1 = vld [vmem:[%s2672_s25 + $0x230] sm:$0xff] }
 0x114   : > { %1789 = vmatpush1.bf16.msra.mxu1 %v1788_v6  ;;  %v898_v6 = vld [vmem:[%s2672_s25 + $0x70] sm:$0xff] }
 0x115   : > { %1791 = vmatprep.subr.bf16.mxu1 %v1790_v7  ;;  %v1846_v7 = vpack.c.bf16 %v954_v1, %v951_v0  ;;  %v1940_v17 = vpack.c.bf16 %v901_v11, %v898_v6  ;;  %v928_v0 = vld [vmem:[%s2672_s25 + $0x160] sm:$0xff]  ;;  %v931_v1 = vld [vmem:[%s2672_s25 + $0x178] sm:$0xff]  ;;  %v1866_v6 = vpack.c.bf16 %v984_v4, %v981_v3 }
 0x116   : > { %v1003_v3 = vld [vmem:[%s2672_s25 + $0x3b8] sm:$0xff]  ;;  %v1008_v4 = vld [vmem:[%s2672_s25 + $0x3e0] sm:$0xff] }
 0x117   : > { %1847 = vmatprep.subr.bf16.mxu0 %v1846_v7  ;;  %v1030_v7 = vld [vmem:[%s2672_s25 + $0x490] sm:$0xff] }
 0x118   : > { %1793 = vmatpush1.bf16.msra.mxu1 %v1792_v14  ;;  %v955_v14 = vld [vmem:[%s2672_s25 + $0x238] sm:$0xff]  ;;  %1849 = vmatpush1.bf16.msra.mxu0 %v1848_v15  ;;  %v1962_v9 = vpack.c.bf16 %v1033_v8, %v1030_v7  ;;  %v1004_v8 = vld [vmem:[%s2672_s25 + $0x3c0] sm:$0xff] }
 0x119   : > { %1795 = vmatprep.subr.bf16.mxu1 %v1794_v19  ;;  %v1942_v22 = vpack.c.bf16 %v955_v14, %v952_v13  ;;  %v2993_v14 = vld [vmem:[%s349_s30] sm:$0xf] }
 0x11c   : > { %1797 = vmatpush1.bf16.msra.mxu1 %v1796_v30  ;;  %v1944_v30 = vpack.c.bf16 %v907_v24, %v904_v18  ;;  %v980_v24 = vld [vmem:[%s2672_s25 + $0x300] sm:$0xff] }
 0x11d   : > { %1799 = vmatprep.subr.bf16.mxu1 %v1798_v35  ;;  %v910_v35 = vld [vmem:[%s2672_s25 + $0xd0] sm:$0xff] }
 0x11e   : > { %v1948_v40 = vpack.c.bf16 %v913_v36, %v910_v35  ;;  %v1868_v35 = vpack.c.bf16 %v983_v25, %v980_v24  ;;  %v986_v36 = vld [vmem:[%s2672_s25 + $0x330] sm:$0xff]  ;;  %v1013_v24 = vld [vmem:[%s2672_s25 + $0x408] sm:$0xff] }
 0x11f   : > { %v1872_v48 = vpack.c.bf16 %v989_v37, %v986_v36  ;;  %v1019_v36 = vld [vmem:[%s2672_s25 + $0x438] sm:$0xff] }
 0x120   : > { %1801 = vmatpush1.bf16.msra.mxu1 %v1800_v46  ;;  %v1952_v46 = vpack.c.bf16 %v919_v43, %v916_v42  ;;  %v1966_v42 = vpack.c.bf16 %v1039_v33, %v1036_v32  ;;  %v988_v43 = vld [vmem:[%s2672_s25 + $0x340] sm:$0xff]  ;;  %v1066_v32 = vld [vmem:[%s2672_s25 + $0x5b0] sm:$0xff]  ;;  %v1069_v33 = vld [vmem:[%s2672_s25 + $0x5c8] sm:$0xff] }
 0x121   : > { %1931 = vmatprep.subr.bf16.mxu1 %v1930_v50  ;;  %v970_v50 = vld [vmem:[%s2672_s25 + $0x2b0] sm:$0xff] }
 0x122   : > { %v1954_v55 = vpack.c.bf16 %v973_v52, %v970_v50  ;;  %v995_v50 = vld [vmem:[%s2672_s25 + $0x378] sm:$0xff] }
 0x123   : > { %871 = vmatmul.mubr.f32.vlgmr.msra.gmra.mrb[2].mxu1 %v2758_v57  ;;  %v960_v57 = vld [vmem:[%s2672_s25 + $0x260] sm:$0xff] }
 0x124   : > { %1933 = vmatpush3.bf16.msra.mxu1 %v1932_v59  ;;  %v1850_v19 = vpack.c.bf16 %v960_v57, %v957_v12  ;;  %v1956_v59 = vpack.c.bf16 %v925_v54, %v922_v53  ;;  %v573_v12 = vlaneseq  ;;  %v999_v53 = vld [vmem:[%s2672_s25 + $0x398] sm:$0xff] }
 0x125   : > { %1935 = vmatprep.subr.bf16.mxu1 %v1934_v63  ;;  %v1864_v63 = vpack.c.bf16 %v977_v61, %v974_v23  ;;  %v1876_v23 = vpack.c.bf16 %v995_v50, %v992_v49  ;;  %v998_v61 = vld [vmem:[%s2672_s25 + $0x390] sm:$0xff]  ;;  %v1878_v16 = vpack.c.bf16 %v1002_v58, %v999_v53  ;;  %v1025_v50 = vld [vmem:[%s2672_s25 + $0x468] sm:$0xff]  ;;  %v1027_v53 = vld [vmem:[%s2672_s25 + $0x478] sm:$0xff] }
 0x126   : > { %1851 = vmatprep.subr.bf16.mxu0 %v1850_v19  ;;  %v2985_v57 = vshrl.u32 %v573_v12, 7  ;;  %v1880_v7 = vpack.c.bf16 %v1001_v62, %v998_v61  ;;  %v1011_v12 = vld [vmem:[%s2672_s25 + $0x3f8] sm:$0xff]  ;;  %v1038_v62 = vld [vmem:[%s2672_s25 + $0x4d0] sm:$0xff] }
 0x127   : > { %1853 = vmatpush1.bf16.msra.mxu0 %v1852_v29  ;;  %v985_v29 = vld [vmem:[%s2672_s25 + $0x328] sm:$0xff]  ;;  %v1035_v61 = vld [vmem:[%s2672_s25 + $0x4b8] sm:$0xff] }
 0x128   : > { %1937 = vmatpush3.bf16.msra.mxu1 %v1936_v5  ;;  %1855 = vmatprep.subr.bf16.mxu0 %v1854_v31  ;;  %v1960_v5 = vpack.c.bf16 %v931_v1, %v928_v0  ;;  %v575_v13 = vsub.s32 0, %v2985_v57  ;;  %v579_v15 = vsub.s32 1, %v2985_v57  ;;  %v990_v31 = vld [vmem:[%s2672_s25 + $0x350] sm:$0xff]  ;;  %v1964_v38 = vpack.c.bf16 %v985_v29, %v982_v28  ;;  %v1005_v0 = vld [vmem:[%s2672_s25 + $0x3c8] sm:$0xff]  ;;  %v1012_v29 = vld [vmem:[%s2672_s25 + $0x400] sm:$0xff] }
 0x129   : > { %1939 = vmatprep.subr.bf16.mxu1 %v1938_v10 }
 0x12a   : > { %v580_v18 = vrot.slane %v2993_v14, %v579_v15  ;;  %v1006_v15 = vld [vmem:[%s2672_s25 + $0x3d0] sm:$0xff] }
 0x12b   : > { %1857 = vmatpush1.bf16.msra.mxu0 %v1856_v39 }
 0x12c   : > { %1941 = vmatpush3.bf16.msra.mxu1 %v1940_v17  ;;  %1859 = vmatprep.subr.bf16.mxu0 %v1858_v47  ;;  %v576_v17 = vrot.slane %v2993_v14, %v575_v13  ;;  %v1045_v47 = vld [vmem:[%s2672_s25 + $0x508] sm:$0xff] }
 0x12d   : > { %1943 = vmatprep.subr.bf16.mxu1 %v1942_v22 }
 0x12f   : > { %1861 = vmatpush1.bf16.msra.mxu0 %v1860_v51  ;;  %v1968_v51 = vpack.c.bf16 %v991_v44, %v988_v43  ;;  %v1026_v43 = vld [vmem:[%s2672_s25 + $0x470] sm:$0xff]  ;;  %v1072_v44 = vld [vmem:[%s2672_s25 + $0x5e0] sm:$0xff] }
 0x130   : > { %1945 = vmatpush3.bf16.msra.mxu1 %v1944_v30  ;;  %1863 = vmatprep.subr.bf16.mxu0 %v1862_v60  ;;  %v1051_v60 = vld [vmem:[%s2672_s25 + $0x538] sm:$0xff] }
 0x131   : > { %1947 = vmatprep.subr.bf16.mxu1 %v1946_v34 }
 0x133   : > { %1865 = vmatpush1.bf16.msra.mxu0 %v1864_v63 }
 0x134   : > { %1949 = vmatpush3.bf16.msra.mxu1 %v1948_v40  ;;  %1867 = vmatprep.subr.bf16.mxu0 %v1866_v6  ;;  %v1870_v40 = vpack.c.bf16 %v990_v31, %v987_v27  ;;  %v1057_v6 = vld [vmem:[%s2672_s25 + $0x568] sm:$0xff]  ;;  %v1020_v31 = vld [vmem:[%s2672_s25 + $0x440] sm:$0xff] }
 0x135   : > { %1951 = vmatprep.subr.bf16.mxu1 %v1950_v41  ;;  %v993_v41 = vld [vmem:[%s2672_s25 + $0x368] sm:$0xff] }
 0x136   : > { %v1874_v52 = vpack.c.bf16 %v996_v45, %v993_v41  ;;  %v1017_v27 = vld [vmem:[%s2672_s25 + $0x428] sm:$0xff]  ;;  %v1018_v41 = vld [vmem:[%s2672_s25 + $0x430] sm:$0xff]  ;;  %v1075_v45 = vld [vmem:[%s2672_s25 + $0x5f8] sm:$0xff] }
 0x138   : > { %1953 = vmatpush3.bf16.msra.mxu1 %v1952_v46  ;;  %v1042_v46 = vld [vmem:[%s2672_s25 + $0x4f0] sm:$0xff] }
 0x139   : > { %1955 = vmatprep.subr.bf16.mxu1 %v1954_v55  ;;  %v1970_v54 = vpack.c.bf16 %v1045_v47, %v1042_v46  ;;  %v994_v55 = vld [vmem:[%s2672_s25 + $0x370] sm:$0xff] }
 0x13a   : > { %v1972_v63 = vpack.c.bf16 %v997_v56, %v994_v55  ;;  %v1022_v47 = vld [vmem:[%s2672_s25 + $0x450] sm:$0xff]  ;;  %v1032_v55 = vld [vmem:[%s2672_s25 + $0x4a0] sm:$0xff] }
 0x13b   : > { %v1896_v56 = vpack.c.bf16 %v1025_v50, %v1022_v47 }
 0x13c   : > { %1957 = vmatpush3.bf16.msra.mxu1 %v1956_v59  ;;  %v1048_v59 = vld [vmem:[%s2672_s25 + $0x520] sm:$0xff] }
 0x13d   : > { %1959 = vmatprep.subr.bf16.mxu1 %v1958_v2  ;;  %v1974_v1 = vpack.c.bf16 %v1051_v60, %v1048_v59  ;;  %v1000_v2 = vld [vmem:[%s2672_s25 + $0x3a0] sm:$0xff] }
 0x13e   : > { %v1028_v60 = vld [vmem:[%s2672_s25 + $0x480] sm:$0xff] }
 0x140   : > { %1961 = vmatpush3.bf16.msra.mxu1 %v1960_v5  ;;  %v1054_v5 = vld [vmem:[%s2672_s25 + $0x550] sm:$0xff] }
 0x141   : > { %1963 = vmatprep.subr.bf16.mxu1 %v1962_v9  ;;  %v1007_v9 = vld [vmem:[%s2672_s25 + $0x3d8] sm:$0xff]  ;;  %v1978_v13 = vpack.c.bf16 %v1057_v6, %v1054_v5  ;;  %v1040_v6 = vld [vmem:[%s2672_s25 + $0x4e0] sm:$0xff] }
 0x196   : > { %v730_v10 = vpop.f32.mrb[0].mxu1 }
 0x197   : > { %v732_v11 = vpop.f32.mrb[1].mxu1 }
 0x1b4   : > { %v659_v19 = vpop.f32.mrb[0].mxu0 }
 0x1b5   : > { %v660_v20 = vadd.f32 %v659_v19, %v576_v17  ;;  %v661_v21 = vpop.f32.mrb[1].mxu0  ;;  %v1009_v17 = vld [vmem:[%s2672_s25 + $0x3e8] sm:$0xff]  ;;  %v1060_v19 = vld [vmem:[%s2672_s25 + $0x580] sm:$0xff] }
 0x1b6   : > { %v662_v22 = vadd.f32 %v661_v21, %v580_v18  ;;  %v1014_v18 = vld [vmem:[%s2672_s25 + $0x410] sm:$0xff]  ;;  %v1884_v21 = vpack.c.bf16 %v1007_v9, %v1004_v8  ;;  %v1980_v25 = vpack.c.bf16 %v1009_v17, %v1006_v15  ;;  %v1047_v8 = vld [vmem:[%s2672_s25 + $0x518] sm:$0xff]  ;;  %v1053_v15 = vld [vmem:[%s2672_s25 + $0x548] sm:$0xff] }
 0x1b7   : > { %v731_v26 = vadd.f32 %v730_v10, %v660_v20  ;;  %v1976_v10 = vpack.c.bf16 %v1003_v3, %v1000_v2  ;;  %v1063_v20 = vld [vmem:[%s2672_s25 + $0x598] sm:$0xff]  ;;  %v1041_v2 = vld [vmem:[%s2672_s25 + $0x4e8] sm:$0xff]  ;;  %v1044_v3 = vld [vmem:[%s2672_s25 + $0x500] sm:$0xff] }
 0x1b8   : > { %v733_v30 = vadd.f32 %v732_v11, %v662_v22  ;;  %v1882_v11 = vpack.c.bf16 %v1008_v4, %v1005_v0  ;;  %v1010_v22 = vld [vmem:[%s2672_s25 + $0x3f0] sm:$0xff]  ;;  %v1982_v28 = vpack.c.bf16 %v1063_v20, %v1060_v19  ;;  %v1906_v5 = vpack.c.bf16 %v1044_v3, %v1041_v2  ;;  %v1056_v17 = vld [vmem:[%s2672_s25 + $0x560] sm:$0xff] }
 0x1b9   : > { %v877_v39 = vmax.f32 %v731_v26, 0.0  ;;  %v1886_v26 = vpack.c.bf16 %v1014_v18, %v1011_v12  ;;  %v1034_v0 = vld [vmem:[%s2672_s25 + $0x4b0] sm:$0xff]  ;;  %v1914_v19 = vpack.c.bf16 %v1056_v17, %v1053_v15  ;;  %v1052_v20 = vld [vmem:[%s2672_s25 + $0x540] sm:$0xff] }
 0x1ba   : > { %v878_v34 = vmax.f32 %v733_v30, 0.0  ;;  %v1015_v30 = vld [vmem:[%s2672_s25 + $0x418] sm:$0xff]  ;;  %v1050_v9 = vld [vmem:[%s2672_s25 + $0x530] sm:$0xff] }
 0x1bb   : > { %v1984_v37 = vpack.c.bf16 %v1015_v30, %v1012_v29  ;;  %v1046_v12 = vld [vmem:[%s2672_s25 + $0x510] sm:$0xff]  ;;  %v1065_v29 = vld [vmem:[%s2672_s25 + $0x5a8] sm:$0xff]  ;;  %v1068_v30 = vld [vmem:[%s2672_s25 + $0x5c0] sm:$0xff] }
 0x1bc   : > { %1140 = vmatprep.mubr.f32.mxu0 %v878_v34  ;;  %1282 = vmatprep.mubr.f32.mxu1 %v878_v34  ;;  %v1888_v34 = vpack.c.bf16 %v1013_v24, %v1010_v22  ;;  %v1059_v22 = vld [vmem:[%s2672_s25 + $0x578] sm:$0xff]  ;;  %v1062_v24 = vld [vmem:[%s2672_s25 + $0x590] sm:$0xff] }
 0x1bd   : > { %1141 = vmatmul.mubr.f32.vlgmr.msra.gmra.mrb[2].mxu0 %v877_v39  ;;  %1283 = vmatmul.mubr.f32.vlgmr.msra.gmra.mrb[4].mxu1 %v877_v39  ;;  %v1023_v39 = vld [vmem:[%s2672_s25 + $0x458] sm:$0xff] }
 0x1be   : > { %1869 = vmatpush1.bf16.msra.mxu0 %v1868_v35  ;;  %1965 = vmatpush3.bf16.msra.mxu1 %v1964_v38  ;;  %v1016_v35 = vld [vmem:[%s2672_s25 + $0x420] sm:$0xff]  ;;  %v1890_v38 = vpack.c.bf16 %v1020_v31, %v1017_v27  ;;  %v1894_v49 = vpack.c.bf16 %v1026_v43, %v1023_v39  ;;  %v1058_v27 = vld [vmem:[%s2672_s25 + $0x570] sm:$0xff] }
 0x1bf   : > { %1871 = vmatprep.subr.bf16.mxu0 %v1870_v40  ;;  %1967 = vmatprep.subr.bf16.mxu1 %v1966_v42  ;;  %v1986_v40 = vpack.c.bf16 %v1069_v33, %v1066_v32  ;;  %v1021_v42 = vld [vmem:[%s2672_s25 + $0x448] sm:$0xff]  ;;  %v1892_v46 = vpack.c.bf16 %v1019_v36, %v1016_v35  ;;  %v583_v32 = vsub.s32 2, %v2985_v57  ;;  %v1922_v33 = vpack.c.bf16 %v1068_v30, %v1065_v29  ;;  %v1064_v35 = vld [vmem:[%s2672_s25 + $0x5a0] sm:$0xff]  ;;  %v1067_v36 = vld [vmem:[%s2672_s25 + $0x5b8] sm:$0xff] }
 0x1c0   : > { %v1070_v43 = vld [vmem:[%s2672_s25 + $0x5d0] sm:$0xff] }
 0x1c1   : > { %v584_v39 = vrot.slane %v2993_v14, %v583_v32 }
 0x1c2   : > { %1873 = vmatpush1.bf16.msra.mxu0 %v1872_v48  ;;  %1969 = vmatpush3.bf16.msra.mxu1 %v1968_v51  ;;  %v1988_v48 = vpack.c.bf16 %v1021_v42, %v1018_v41  ;;  %v1990_v51 = vpack.c.bf16 %v1075_v45, %v1072_v44  ;;  %v1073_v44 = vld [vmem:[%s2672_s25 + $0x5e8] sm:$0xff] }
 0x1c3   : > { %1875 = vmatprep.subr.bf16.mxu0 %v1874_v52  ;;  %1971 = vmatprep.subr.bf16.mxu1 %v1970_v54  ;;  %v1024_v52 = vld [vmem:[%s2672_s25 + $0x460] sm:$0xff]  ;;  %v1029_v54 = vld [vmem:[%s2672_s25 + $0x488] sm:$0xff] }
 0x1c4   : > { %v1992_v58 = vpack.c.bf16 %v1027_v53, %v1024_v52  ;;  %v1898_v59 = vpack.c.bf16 %v1032_v55, %v1029_v54  ;;  %v881_v53 = vld [vmem:[#allocation2] sm:$0xff]  ;;  %v882_v55 = vld [vmem:[#allocation2 + $0x8] sm:$0xff] }
 0x1c6   : > { %1877 = vmatpush1.bf16.msra.mxu0 %v1876_v23  ;;  %1973 = vmatpush3.bf16.msra.mxu1 %v1972_v63  ;;  %v1031_v23 = vld [vmem:[%s2672_s25 + $0x498] sm:$0xff] }
 0x1c7   : > { %1879 = vmatprep.subr.bf16.mxu0 %v1878_v16  ;;  %1975 = vmatprep.subr.bf16.mxu1 %v1974_v1  ;;  %v1900_v63 = vpack.c.bf16 %v1031_v23, %v1028_v60  ;;  %v1902_v16 = vpack.c.bf16 %v1038_v62, %v1035_v61  ;;  %v1037_v1 = vld [vmem:[%s2672_s25 + $0x4c8] sm:$0xff] }
 0x1c8   : > { %v1904_v4 = vpack.c.bf16 %v1037_v1, %v1034_v0  ;;  %v883_v61 = vld [vmem:[#allocation2 + $0x10] sm:$0xff] }
 0x1ca   : > { %1881 = vmatpush1.bf16.msra.mxu0 %v1880_v7  ;;  %1977 = vmatpush3.bf16.msra.mxu1 %v1976_v10  ;;  %v1043_v7 = vld [vmem:[%s2672_s25 + $0x4f8] sm:$0xff] }
 0x1cb   : > { %1883 = vmatprep.subr.bf16.mxu0 %v1882_v11  ;;  %1979 = vmatprep.subr.bf16.mxu1 %v1978_v13  ;;  %v1908_v10 = vpack.c.bf16 %v1043_v7, %v1040_v6  ;;  %v1910_v11 = vpack.c.bf16 %v1050_v9, %v1047_v8  ;;  %v1049_v13 = vld [vmem:[%s2672_s25 + $0x528] sm:$0xff] }
 0x1cc   : > { %v1912_v18 = vpack.c.bf16 %v1049_v13, %v1046_v12 }
 0x1ce   : > { %1885 = vmatpush1.bf16.msra.mxu0 %v1884_v21  ;;  %1981 = vmatpush3.bf16.msra.mxu1 %v1980_v25  ;;  %v1055_v21 = vld [vmem:[%s2672_s25 + $0x558] sm:$0xff] }
 0x1cf   : > { %1887 = vmatprep.subr.bf16.mxu0 %v1886_v26  ;;  %1983 = vmatprep.subr.bf16.mxu1 %v1982_v28  ;;  %v1916_v25 = vpack.c.bf16 %v1055_v21, %v1052_v20  ;;  %v1918_v26 = vpack.c.bf16 %v1062_v24, %v1059_v22  ;;  %v1061_v28 = vld [vmem:[%s2672_s25 + $0x588] sm:$0xff] }
 0x1d0   : > { %v1920_v31 = vpack.c.bf16 %v1061_v28, %v1058_v27 }
 0x1d2   : > { %1889 = vmatpush1.bf16.msra.mxu0 %v1888_v34  ;;  %1985 = vmatpush3.bf16.msra.mxu1 %v1984_v37  ;;  %v587_v34 = vsub.s32 3, %v2985_v57  ;;  %v1071_v37 = vld [vmem:[%s2672_s25 + $0x5d8] sm:$0xff] }
 0x1d3   : > { %1891 = vmatprep.subr.bf16.mxu0 %v1890_v38  ;;  %1987 = vmatprep.subr.bf16.mxu1 %v1986_v40  ;;  %v1074_v38 = vld [vmem:[%s2672_s25 + $0x5f0] sm:$0xff]  ;;  %v1924_v40 = vpack.c.bf16 %v1067_v36, %v1064_v35 }
 0x1d4   : > { %v588_v41 = vrot.slane %v2993_v14, %v587_v34  ;;  %v1926_v42 = vpack.c.bf16 %v1074_v38, %v1071_v37 }
 0x1d6   : > { %1893 = vmatpush1.bf16.msra.mxu0 %v1892_v46  ;;  %1989 = vmatpush3.bf16.msra.mxu1 %v1988_v48  ;;  %v1928_v48 = vpack.c.bf16 %v1073_v44, %v1070_v43 }
 0x1d7   : > { %1895 = vmatprep.subr.bf16.mxu0 %v1894_v49  ;;  %1991 = vmatprep.subr.bf16.mxu1 %v1990_v51 }
 0x1da   : > { %1897 = vmatpush1.bf16.msra.mxu0 %v1896_v56  ;;  %1993 = vmatpush3.bf16.msra.mxu1 %v1992_v58 }
 0x1db   : > { %1899 = vmatprep.subr.bf16.mxu0 %v1898_v59 }
 0x1de   : > { %1901 = vmatpush1.bf16.msra.mxu0 %v1900_v63 }
 0x1df   : > { %1903 = vmatprep.subr.bf16.mxu0 %v1902_v16 }
 0x1e2   : > { %1905 = vmatpush1.bf16.msra.mxu0 %v1904_v4 }
 0x1e3   : > { %1907 = vmatprep.subr.bf16.mxu0 %v1906_v5 }
 0x1e6   : > { %1909 = vmatpush1.bf16.msra.mxu0 %v1908_v10 }
 0x1e7   : > { %1911 = vmatprep.subr.bf16.mxu0 %v1910_v11 }
 0x1ea   : > { %1913 = vmatpush1.bf16.msra.mxu0 %v1912_v18 }
 0x1eb   : > { %1915 = vmatprep.subr.bf16.mxu0 %v1914_v19 }
 0x1ee   : > { %1917 = vmatpush1.bf16.msra.mxu0 %v1916_v25 }
 0x1ef   : > { %1919 = vmatprep.subr.bf16.mxu0 %v1918_v26 }
 0x1f2   : > { %1921 = vmatpush1.bf16.msra.mxu0 %v1920_v31 }
 0x1f3   : > { %1923 = vmatprep.subr.bf16.mxu0 %v1922_v33 }
 0x1f6   : > { %v872_v45 = vpop.f32.mrb[2].mxu1  ;;  %1925 = vmatpush1.bf16.msra.mxu0 %v1924_v40 }
 0x1f7   : > { %v1998_v46 = vadd.f32 %v872_v45, %v584_v39  ;;  %v874_v47 = vpop.f32.mrb[3].mxu1  ;;  %1927 = vmatprep.subr.bf16.mxu0 %v1926_v42 }
 0x1f8   : > { %v1999_v57 = vadd.f32 %v874_v47, %v588_v41 }
 0x1f9   : > { %v879_v50 = vmax.f32 %v1998_v46, 0.0 }
 0x1fa   : > { %v880_v49 = vmax.f32 %v1999_v57, 0.0  ;;  %1929 = vmatpush1.bf16.msra.mxu0 %v1928_v48 }
 0x1fc   : > { %1211 = vmatprep.mubr.f32.mxu0 %v880_v49  ;;  %1352 = vmatprep.mubr.f32.mxu1 %v880_v49 }
 0x1fd   : > { %1353 = vmatmul.mubr.f32.vlgmr.msra.gmra.mrb[6].mxu1 %v879_v50  ;;  %1212 = vmatmul.mubr.f32.vlgmr.msra.gmra.mrb[2].mxu0 %v879_v50 }
 0x290   : > { %v1572_v51 = vpop.f32.mrb[4].mxu1 }
 0x291   : > { %v1573_v52 = vpop.f32.mrb[5].mxu1 }
 0x292   : > { %v1574_v14 = vadd.f32 %v1573_v52, %v1572_v51 }
 0x2d0   : > { %v1607_v54 = vpop.f32.mrb[6].mxu1  ;;  %v1213_v56 = vpop.f32.mrb[2].mxu0 }
 0x2d1   : > { %v1608_v58 = vpop.f32.mrb[7].mxu1  ;;  %v1358_v59 = vadd.f32 %v1213_v56, %v881_v53  ;;  %v1215_v23 = vpop.f32.mrb[3].mxu0 }
 0x2d2   : > { %v1609_v60 = vadd.f32 %v1608_v58, %v1607_v54  ;;  %v1359_v62 = vadd.f32 %v1215_v23, %v882_v55  ;;  %1367 = sbr.rel (%p1535_p5) target bundleno = 737 (0x2e1), region = 60 }
 0x2d3   : > { %1361 = vst [vmem:[#allocation2] sm:$0xff] %v1358_v59 }
 0x2d4   : > { %v1355_v63 = vadd.f32 %v1609_v60, %v1574_v14  ;;  %1362 = vst [vmem:[#allocation2 + $0x8] sm:$0xff] %v1359_v62 }
 0x2d6   : > { %v1360_v16 = vadd.f32 %v1355_v63, %v883_v61 }
 0x2d8   : > { %1363 = vst [vmem:[#allocation2 + $0x10] sm:$0xff] %v1360_v16 }
 0x2da   : > { %v1368_v0 = vld [vmem:[#allocation2] sm:$0xff] }
 0x2db   : > { %v1369_v1 = vld [vmem:[#allocation2 + $0x8] sm:$0xff]  ;;  %1371 = vst [vmem:[%s2674_s8] sm:$0xff] %v1368_v0 }
 0x2dc   : > { %1372 = vst [vmem:[%s2674_s8 + $0x8] sm:$0xff] %v1369_v1 }
 0x2df   : > { %v1370_v2 = vld [vmem:[#allocation2 + $0x10] sm:$0xff] }
 0x2e0   : > { %1373 = vst [vmem:[%s2674_s8 + $0x10] sm:$0xff] %v1370_v2 }
 0x2e1 PF: > { %s3210_s23 = sld [smem:[#allocation15_spill]]  ;;  %s1389_s13 = sshll.u32 %s2674_s8, 4  ;;  %s1390_s13 = int_to_ptr.vmem [resolvable:$true] %s1389_s13 }
 0x2e2   : > { %s3211_s24 = sld [smem:[#allocation25_spill]]  ;;  %s1375_s11 = scalar_lea.sflag [#allocation5], %s2647_s20 }
 0x2e3   : > { %s2220_s4 = scalar_lea.vmem %s1390_s13, 384  ;;  %p3213_p13 = scmp.ne.s32.totalorder %s3198_s5, 0 }
 0x2e4   : > { %p2221_p8 = scmp.ne.s32.totalorder %s1390_s13, %s2220_s4  ;;  %s2357_s7 = smov [#allocation9]  }
 0x2e5   : > { %s2224_s27 = sshll.u32 %s2357_s7, 4  ;;  %s2225_s27 = int_to_ptr.vmem [resolvable:$false] %s2224_s27 }
 0x2e6   : > { %p2222_p9 = pnand %p2221_p8, %p3213_p13  ;;  %s2226_s9 = scalar_lea.vmem %s2225_s27, 768 }
 0x2e7   : > { %s2011_s2 = smul.u32 384, %s3210_s23  ;;  %p2227_p12 = scmp.lt.s32.totalorder %s1390_s13, %s2225_s27 }
 0x2e8   : > { %s3212_s10 = smov %s3211_s24  ;;  %p2223_p2 = pneg %p2222_p9 }
 0x2e9   : > { %s3103_s14 = scalar_lea.hbm %s3211_s24, %s2011_s2  ;;  %p2228_p11 = scmp.lt.s32.totalorder %s2226_s9, %s2220_s4 }
 0x2eb   : > { %p2229_p3 = por %p2228_p11, %p2227_p12 }
 0x2ed   : > { %p2230_p0 = pnand %p2229_p3, %p2223_p2 }
 0x2ef   : > { %2233 = shalt.err (!%p2230_p0)
}
 0x2f0   : > { %s2234_s20 = scalar_lea.hbm %s3103_s14, 384  ;;  %s2238_s8 = scalar_lea.hbm %s3212_s10, 768 }
 0x2f1   : > { %p2235_p7 = scmp.ne.s32.totalorder %s3103_s14, %s2234_s20  ;;  %p2239_p10 = scmp.lt.u32.totalorder %s3103_s14, %s3212_s10 }
 0x2f2   : > { %p2240_p6 = scmp.lt.u32.totalorder %s2238_s8, %s2234_s20  ;;  %p2242_p8 = scmp.lt.u32.totalorder %s2234_s20, %s3103_s14 }
 0x2f3   : > { %p2236_p1 = pnand %p2235_p7, %p3213_p13 }
 0x2f4   : > { %p2241_p5 = por %p2240_p6, %p2239_p10 }
 0x2f5   : > { %p2237_p4 = pneg %p2236_p1 }
 0x2f6   : > { %p2243_p9 = por %p2242_p8, %p2241_p5 }
 0x2f8   : > { %p2244_p2 = pnand %p2243_p9, %p2237_p4 }
 0x2fa   : > { %2247 = shalt.err (!%p2244_p2)
}
 0x2fb   : > { %2018 = dma.vmem_to_hbm [thread:$0]  (%p3213_p13), %s1390_s13, 384, %s3103_s14, %s1375_s11  }
 0x2fc PF: > { %p2035_p12 = scmp.ge.s32.totalorder %s2346_s28, 2  ;;  %s1401_s18 = sand.u32 1, %s2318_s21  }
 0x2fd   : > { %p3214_p11 = scmp.ne.s32.totalorder %s3199_s6, 0  ;;  %s1402_s16 = scalar_lea.sflag [#allocation5], %s1401_s18 }
 0x2ff   : > { %p2031_p3 = pnand %p2035_p12, %p3214_p11 }
 0x301   : > { %2301 = dma.done.wait (!%p2031_p3), %s1402_s16, 384  }
 0x302   : > { %2303 = vsyncadd (!%p2031_p3), %s1402_s16, 4294966912  ;;  %s24_s28 = sadd.s32 1, %s2346_s28   ;;  %s3215_s1 = sld [smem:[#allocation13_spill]] }
 0x303   : > { %p21_p0 = scmp.ge.s32.totalorder %s24_s28, 8   ;;  %s3216_s20 = sld [smem:[#allocation20_spill]] }
 0x304   : > { %s3217_s5 = sld [smem:[#allocation14_spill]]  ;;  %s3218_s23 = sld [smem:[#allocation21_spill]] }
 0x305   : > { %s3219_s24 = sld [smem:[#allocation16_spill]]  ;;  %s3220_s25 = sld [smem:[#allocation17_spill]] }
 0x306   : > { %s3221_s26 = sld [smem:[#allocation18_spill]]  ;;  %s3222_s27 = sld [smem:[#allocation19_spill]] }
 0x307   : > { %s3223_s18 = smov %s2310_s19  ;;  %s3225_s21 = smov %s2322_s22 }
 0x308   : > { %s3224_s19 = smov %s3215_s1  ;;  %23 = sbr.rel (!%p21_p0) target bundleno = 16 (0x10), region = 120 }
 0x30a   : > { %s3226_s22 = smov %s3217_s5 }
 0x30f   :  { %1407 = vsyncpa [#allocation4], 1 }
 0x310   :  { %1409 = vsyncpa [#allocation4 + $0x1], 1 }
 0x311   :  { %1410 = vsyncpa [#allocation7], 1 }
 0x312   :  { %1412 = vsyncpa [#allocation7 + $0x1], 1 }
 0x313   :  { %1413 = vsyncpa [#allocation5], 1 }
 0x314   :  { %1415 = vsyncpa [#allocation5 + $0x1], 1 }

</bundles_post_ra>
